<compile_context>
chip_gen: v7x
topology: tpu7x:2x2x1
jax: 0.10.0
libtpu: 0.0.40
codegen_flags: <defaults>
</compile_context>

<pallas_src>
import jax
import jax.numpy as jnp
from jax.experimental import pallas as pl
from jax.experimental.pallas import tpu as pltpu


def _cdiv(a, b):
    return -(-a // b)


def _round_up(x, m):
    return _cdiv(x, m) * m


def _num_parallel_tiles():
    """2 on v7x (two TensorCores per chip), 1 on v5e/v6e (single TC)."""
    try:
        kind = jax.devices()[0].device_kind.lower()
    except Exception:
        return 1
    return 2 if "v7" in kind else 1


def _critic_kernel(s_ref, a_ref, w1s_ref, w1a_ref, b1_ref,
                   w2_ref, b2_ref, w3_ref, b3_ref, o_ref):
    # All activations are (hidden, TILE_B): batch along lanes (lane-dense).
    # fc1 (concat-free): W1^T @ x^T == W1[:sd]^T @ s^T + W1[sd:]^T @ a^T
    h1 = (jnp.dot(w1s_ref[...], s_ref[...], preferred_element_type=jnp.float32)
          + jnp.dot(w1a_ref[...], a_ref[...], preferred_element_type=jnp.float32)
          + b1_ref[...])                              # (hidden, TILE_B) f32
    h1 = jnp.maximum(h1, 0.0)                         # ReLU on VPU (f32)

    # fc2: the only fat matmul (hidden x hidden x TILE_B) -> MXU, bf16 operands.
    h2 = jnp.dot(w2_ref[...], h1.astype(w2_ref.dtype),
                 preferred_element_type=jnp.float32) + b2_ref[...]
    h2 = jnp.maximum(h2, 0.0)                         # (hidden, TILE_B) f32

    # fc3 (out_features == 1): f32 VPU multiply + sublane reduction; the result
    # lands directly as a lane-dense (1, TILE_B) row (hides under MXU time).
    q = jnp.sum(h2 * w3_ref[...], axis=0, keepdims=True) + b3_ref[...]
    o_ref[...] = q.astype(o_ref.dtype)                # full-lane stores


def critic_forward(state, action, params, *, tile_b_max=2048, use_bf16=True):
    """state: [B, state_dim], action: [B, action_dim] -> q: [B, 1] (float32)."""
    w1, b1, w2, b2, w3, b3 = params
    batch, state_dim = state.shape
    action_dim = action.shape[1]

    # ---- trace-time parameter prep (transposed for batch-on-lanes layout) ----
    w1s_t = jnp.transpose(w1[:state_dim])     # (hidden, state_dim)
    w1a_t = jnp.transpose(w1[state_dim:])     # (hidden, action_dim)
    w2_t = jnp.transpose(w2)                  # (hidden, hidden)
    b1_c = jnp.transpose(b1)                  # (hidden, 1)  f32
    b2_c = jnp.transpose(b2)                  # (hidden, 1)  f32
    w3_c = w3                                 # (hidden, 1)  f32 (fc3 stays f32)
    b3_c = b3                                 # (1, 1)       f32

    # ---- inputs: transpose; bf16 cast fuses with it in XLA (no extra copy) ----
    s_t = jnp.transpose(state)                # (state_dim, B)
    a_t = jnp.transpose(action)               # (action_dim, B)
    if use_bf16:
        s_t = s_t.astype(jnp.bfloat16)
        a_t = a_t.astype(jnp.bfloat16)
        w1s_t = w1s_t.astype(jnp.bfloat16)
        w1a_t = w1a_t.astype(jnp.bfloat16)
        w2_t = w2_t.astype(jnp.bfloat16)

    # ---- batch tiling: few huge tiles, minimal pad waste ----
    n_parallel = _num_parallel_tiles()
    if batch > 128:
        num_tiles = max(n_parallel, _cdiv(batch, tile_b_max))
    else:
        num_tiles = 1                          # tiny batch: one step is cheapest
    align = 128 if num_tiles > 1 else 8        # lane dim; 128 needed when tiled
    tile_b = _round_up(_cdiv(batch, num_tiles), align)
    b_pad = num_tiles * tile_b

    if b_pad != batch:
        pad = b_pad - batch
        s_t = jnp.pad(s_t, ((0, 0), (0, pad)))
        a_t = jnp.pad(a_t, ((0, 0), (0, pad)))

    const2 = lambda i: (0, 0)                  # resident weights/biases

    q_row = pl.pallas_call(
        _critic_kernel,
        out_shape=jax.ShapeDtypeStruct((1, b_pad), jnp.float32),
        grid=(num_tiles,),
        in_specs=[
            pl.BlockSpec((state_dim, tile_b), lambda i: (0, i)),
            pl.BlockSpec((action_dim, tile_b), lambda i: (0, i)),
            pl.BlockSpec(w1s_t.shape, const2),
            pl.BlockSpec(w1a_t.shape, const2),
            pl.BlockSpec(b1_c.shape, const2),
            pl.BlockSpec(w2_t.shape, const2),
            pl.BlockSpec(b2_c.shape, const2),
            pl.BlockSpec(w3_c.shape, const2),
            pl.BlockSpec(b3_c.shape, const2),
        ],
        out_specs=pl.BlockSpec((1, tile_b), lambda i: (0, i)),
        compiler_params=pltpu.CompilerParams(
            dimension_semantics=("parallel",)),
    )(s_t, a_t, w1s_t, w1a_t, b1_c, w2_t, b2_c, w3_c, b3_c)

    return q_row[0, :batch].reshape(batch, 1)


def init_critic_params(key, state_dim, action_dim, hidden=256):
    """Deterministic init mirroring nn.Linear shapes (stored transposed)."""
    in_dim = state_dim + action_dim
    k1, k2, k3, k4, k5, k6 = jax.random.split(key, 6)

    def lin(kw, kb, fan_in, fan_out):
        bound = 1.0 / jnp.sqrt(fan_in)
        w = jax.random.uniform(kw, (fan_in, fan_out), jnp.float32, -bound, bound)
        b = jax.random.uniform(kb, (1, fan_out), jnp.float32, -bound, bound)
        return w, b

    w1, b1 = lin(k1, k2, in_dim, hidden)
    w2, b2 = lin(k3, k4, hidden, hidden)
    w3, b3 = lin(k5, k6, hidden, 1)
    return (w1, b1, w2, b2, w3, b3)


def _reference(state, action, params):
    w1, b1, w2, b2, w3, b3 = params
    x = jnp.concatenate([state, action], axis=1)
    h = jnp.maximum(x @ w1 + b1, 0.0)
    h = jnp.maximum(h @ w2 + b2, 0.0)
    return h @ w3 + b3


if __name__ == "__main__":
    key = jax.random.PRNGKey(0)
    kp, ks1, ka1, ks2, ka2 = jax.random.split(key, 5)

    state_dim, action_dim = 16, 8
    params = init_critic_params(kp, state_dim, action_dim)

    # --- tiny batch: single grid step, clamped tile ---
    batch1 = 8
    s1 = jax.random.normal(ks1, (batch1, state_dim), jnp.float32)
    a1 = jax.random.normal(ka1, (batch1, action_dim), jnp.float32)
    ref1 = _reference(s1, a1, params)

    q1 = jax.block_until_ready(critic_forward(s1, a1, params))            # bf16 default
    assert q1.shape == (batch1, 1)
    assert jnp.allclose(q1, ref1, atol=1e-1, rtol=1e-1)

    q1f = jax.block_until_ready(critic_forward(s1, a1, params, use_bf16=False))
    assert jnp.allclose(q1f, ref1, atol=1e-4, rtol=1e-4)

    # --- awkward batch, forced multi-tile path (exercises grid>1 + padding) ---
    batch2 = 300
    s2 = jax.random.normal(ks2, (batch2, state_dim), jnp.float32)
    a2 = jax.random.normal(ka2, (batch2, action_dim), jnp.float32)
    ref2 = _reference(s2, a2, params)

    q2 = jax.block_until_ready(critic_forward(s2, a2, params, tile_b_max=128))
    assert q2.shape == (batch2, 1)
    assert jnp.allclose(q2, ref2, atol=1e-1, rtol=1e-1)

    q2f = jax.block_until_ready(
        critic_forward(s2, a2, params, tile_b_max=128, use_bf16=False))
    assert jnp.allclose(q2f, ref2, atol=1e-4, rtol=1e-4)

    # --- default large-tile config (1 step on v5e/v6e, 2 on v7x) ---
    q3 = jax.block_until_ready(critic_forward(s2, a2, params))
    assert q3.shape == (batch2, 1)
    assert jnp.allclose(q3, ref2, atol=1e-1, rtol=1e-1)

    print("KERNEL_OK")
</pallas_src>

<mosaic_0001>
module attributes {stable_mosaic.version = 11 : i64} {
  func.func @_critic_kernel(%arg0: i32, %arg1: memref<16x8xbf16, #tpu.memory_space<vmem>>, %arg2: memref<8x8xbf16, #tpu.memory_space<vmem>>, %arg3: memref<256x16xbf16, #tpu.memory_space<vmem>>, %arg4: memref<256x8xbf16, #tpu.memory_space<vmem>>, %arg5: memref<256x1xf32, #tpu.memory_space<vmem>>, %arg6: memref<256x256xbf16, #tpu.memory_space<vmem>>, %arg7: memref<256x1xf32, #tpu.memory_space<vmem>>, %arg8: memref<256x1xf32, #tpu.memory_space<vmem>>, %arg9: memref<1x1xf32, #tpu.memory_space<vmem>>, %arg10: memref<1x8xf32, #tpu.memory_space<vmem>>) attributes {dimension_semantics = [#tpu.dimension_semantics<parallel>], iteration_bounds = array<i64: 1>, scalar_prefetch = 0 : i64, scratch_operands = 0 : i64, tpu.core_type = #tpu.core_type<tc>, window_params = [{transform_indices = @transform_0, window_bounds = array<i64: 16, 8>}, {transform_indices = @transform_1, window_bounds = array<i64: 8, 8>}, {pipeline_mode = #tpu.pipeline_mode<synchronous>, transform_indices = @transform_2, window_bounds = array<i64: 256, 16>}, {pipeline_mode = #tpu.pipeline_mode<synchronous>, transform_indices = @transform_3, window_bounds = array<i64: 256, 8>}, {pipeline_mode = #tpu.pipeline_mode<synchronous>, transform_indices = @transform_4, window_bounds = array<i64: 256, 1>}, {pipeline_mode = #tpu.pipeline_mode<synchronous>, transform_indices = @transform_5, window_bounds = array<i64: 256, 256>}, {pipeline_mode = #tpu.pipeline_mode<synchronous>, transform_indices = @transform_6, window_bounds = array<i64: 256, 1>}, {pipeline_mode = #tpu.pipeline_mode<synchronous>, transform_indices = @transform_7, window_bounds = array<i64: 256, 1>}, {pipeline_mode = #tpu.pipeline_mode<synchronous>, transform_indices = @transform_8, window_bounds = array<i64: 1, 1>}, {transform_indices = @transform_9, window_bounds = array<i64: 1, 8>}]} {
    %c0 = arith.constant 0 : index
    %c0_0 = arith.constant 0 : index
    %0 = vector.load %arg3[%c0, %c0_0] : memref<256x16xbf16, #tpu.memory_space<vmem>>, vector<256x16xbf16>
    %c0_1 = arith.constant 0 : index
    %c0_2 = arith.constant 0 : index
    %1 = vector.load %arg1[%c0_1, %c0_2] : memref<16x8xbf16, #tpu.memory_space<vmem>>, vector<16x8xbf16>
    %cst = arith.constant dense<0.000000e+00> : vector<256x8xf32>
    %2 = tpu.matmul %0, %1, %cst {dimension_numbers = #tpu.dot_dimension_numbers<[1], [0], [0], [1], [0, 0, 1, 1], [], []>} : vector<256x16xbf16>, vector<16x8xbf16>, vector<256x8xf32> -> vector<256x8xf32>
    %c0_3 = arith.constant 0 : index
    %c0_4 = arith.constant 0 : index
    %3 = vector.load %arg4[%c0_3, %c0_4] : memref<256x8xbf16, #tpu.memory_space<vmem>>, vector<256x8xbf16>
    %c0_5 = arith.constant 0 : index
    %c0_6 = arith.constant 0 : index
    %4 = vector.load %arg2[%c0_5, %c0_6] : memref<8x8xbf16, #tpu.memory_space<vmem>>, vector<8x8xbf16>
    %cst_7 = arith.constant dense<0.000000e+00> : vector<256x8xf32>
    %5 = tpu.matmul %3, %4, %cst_7 {dimension_numbers = #tpu.dot_dimension_numbers<[1], [0], [0], [1], [0, 0, 1, 1], [], []>} : vector<256x8xbf16>, vector<8x8xbf16>, vector<256x8xf32> -> vector<256x8xf32>
    %6 = arith.addf %2, %5 : vector<256x8xf32>
    %c0_8 = arith.constant 0 : index
    %c0_9 = arith.constant 0 : index
    %7 = vector.load %arg5[%c0_8, %c0_9] : memref<256x1xf32, #tpu.memory_space<vmem>>, vector<256x1xf32>
    %8 = vector.broadcast %7 : vector<256x1xf32> to vector<256x8xf32>
    %9 = arith.addf %6, %8 : vector<256x8xf32>
    %cst_10 = arith.constant 0.000000e+00 : f32
    %10 = vector.broadcast %cst_10 : f32 to vector<256x8xf32>
    %11 = arith.maximumf %9, %10 : vector<256x8xf32>
    %c0_11 = arith.constant 0 : index
    %c0_12 = arith.constant 0 : index
    %12 = vector.load %arg6[%c0_11, %c0_12] : memref<256x256xbf16, #tpu.memory_space<vmem>>, vector<256x256xbf16>
    %13 = arith.truncf %11 : vector<256x8xf32> to vector<256x8xbf16>
    %cst_13 = arith.constant dense<0.000000e+00> : vector<256x8xf32>
    %14 = tpu.matmul %12, %13, %cst_13 {dimension_numbers = #tpu.dot_dimension_numbers<[1], [0], [0], [1], [0, 0, 1, 1], [], []>} : vector<256x256xbf16>, vector<256x8xbf16>, vector<256x8xf32> -> vector<256x8xf32>
    %c0_14 = arith.constant 0 : index
    %c0_15 = arith.constant 0 : index
    %15 = vector.load %arg7[%c0_14, %c0_15] : memref<256x1xf32, #tpu.memory_space<vmem>>, vector<256x1xf32>
    %16 = vector.broadcast %15 : vector<256x1xf32> to vector<256x8xf32>
    %17 = arith.addf %14, %16 : vector<256x8xf32>
    %cst_16 = arith.constant 0.000000e+00 : f32
    %18 = vector.broadcast %cst_16 : f32 to vector<256x8xf32>
    %19 = arith.maximumf %17, %18 : vector<256x8xf32>
    %c0_17 = arith.constant 0 : index
    %c0_18 = arith.constant 0 : index
    %20 = vector.load %arg8[%c0_17, %c0_18] : memref<256x1xf32, #tpu.memory_space<vmem>>, vector<256x1xf32>
    %21 = vector.broadcast %20 : vector<256x1xf32> to vector<256x8xf32>
    %22 = arith.mulf %19, %21 : vector<256x8xf32>
    %cst_19 = arith.constant dense<0.000000e+00> : vector<8xf32>
    %23 = vector.multi_reduction <add>, %22, %cst_19 [0] : vector<256x8xf32> to vector<8xf32>
    %24 = vector.shape_cast %23 : vector<8xf32> to vector<1x8xf32>
    %c0_20 = arith.constant 0 : index
    %c0_21 = arith.constant 0 : index
    %25 = vector.load %arg9[%c0_20, %c0_21] : memref<1x1xf32, #tpu.memory_space<vmem>>, vector<1x1xf32>
    %26 = vector.broadcast %25 : vector<1x1xf32> to vector<1x8xf32>
    %27 = arith.addf %24, %26 : vector<1x8xf32>
    %c0_22 = arith.constant 0 : index
    %c0_23 = arith.constant 0 : index
    %28 = vector.load %arg10[%c0_22, %c0_23] : memref<1x8xf32, #tpu.memory_space<vmem>>, vector<1x8xf32>
    tpu.vector_store %arg10[%c0_22, %c0_23], %27 {strides = array<i32>} : memref<1x8xf32, #tpu.memory_space<vmem>>, vector<1x8xf32>,
    return
  }
  func.func @transform_0(%arg0: i32) -> (i32, i32) {
    %c0_i32 = arith.constant 0 : i32
    %c0_i32_0 = arith.constant 0 : i32
    return %c0_i32, %arg0 : i32, i32
  }
  func.func @transform_1(%arg0: i32) -> (i32, i32) {
    %c0_i32 = arith.constant 0 : i32
    %c0_i32_0 = arith.constant 0 : i32
    return %c0_i32, %arg0 : i32, i32
  }
  func.func @transform_2(%arg0: i32) -> (i32, i32) {
    %c0_i32 = arith.constant 0 : i32
    %c0_i32_0 = arith.constant 0 : i32
    %c0_i32_1 = arith.constant 0 : i32
    return %c0_i32, %c0_i32_0 : i32, i32
  }
  func.func @transform_3(%arg0: i32) -> (i32, i32) {
    %c0_i32 = arith.constant 0 : i32
    %c0_i32_0 = arith.constant 0 : i32
    %c0_i32_1 = arith.constant 0 : i32
    return %c0_i32, %c0_i32_0 : i32, i32
  }
  func.func @transform_4(%arg0: i32) -> (i32, i32) {
    %c0_i32 = arith.constant 0 : i32
    %c0_i32_0 = arith.constant 0 : i32
    %c0_i32_1 = arith.constant 0 : i32
    return %c0_i32, %c0_i32_0 : i32, i32
  }
  func.func @transform_5(%arg0: i32) -> (i32, i32) {
    %c0_i32 = arith.constant 0 : i32
    %c0_i32_0 = arith.constant 0 : i32
    %c0_i32_1 = arith.constant 0 : i32
    return %c0_i32, %c0_i32_0 : i32, i32
  }
  func.func @transform_6(%arg0: i32) -> (i32, i32) {
    %c0_i32 = arith.constant 0 : i32
    %c0_i32_0 = arith.constant 0 : i32
    %c0_i32_1 = arith.constant 0 : i32
    return %c0_i32, %c0_i32_0 : i32, i32
  }
  func.func @transform_7(%arg0: i32) -> (i32, i32) {
    %c0_i32 = arith.constant 0 : i32
    %c0_i32_0 = arith.constant 0 : i32
    %c0_i32_1 = arith.constant 0 : i32
    return %c0_i32, %c0_i32_0 : i32, i32
  }
  func.func @transform_8(%arg0: i32) -> (i32, i32) {
    %c0_i32 = arith.constant 0 : i32
    %c0_i32_0 = arith.constant 0 : i32
    %c0_i32_1 = arith.constant 0 : i32
    return %c0_i32, %c0_i32_0 : i32, i32
  }
  func.func @transform_9(%arg0: i32) -> (i32, i32) {
    %c0_i32 = arith.constant 0 : i32
    %c0_i32_0 = arith.constant 0 : i32
    return %c0_i32, %arg0 : i32, i32
  }
}

</mosaic_0001>

<bundles_post_ra>
// kernel: tpu_custom_call.1
= control target key start
LH: loop header
LB: loop body
LE: loop exit
PB: predicated region body
PF: predicated region fallthrough
CT: control target
= control target key end

     0   :  { %s3100_s0 = inlined_call_operand.vmem [shape: bf16[16,8], index: 0, kind: input, shape index: {}]   ;;  %s3101_s1 = inlined_call_operand.vmem [shape: bf16[8,8], index: 1, kind: input, shape index: {}]   ;;  %s3102_s2 = inlined_call_operand.vmem [shape: bf16[256,16], index: 2, kind: input, shape index: {}]   ;;  %s3103_s3 = inlined_call_operand.vmem [shape: bf16[256,8], index: 3, kind: input, shape index: {}]   ;;  %s3104_s4 = inlined_call_operand.vmem [shape: f32[256,1], index: 4, kind: input, shape index: {}]   ;;  %s3105_s5 = inlined_call_operand.vmem [shape: bf16[256,256], index: 5, kind: input, shape index: {}]   ;;  %s3106_s6 = inlined_call_operand.vmem [shape: f32[256,1], index: 6, kind: input, shape index: {}]   ;;  %s3107_s7 = inlined_call_operand.vmem [shape: f32[256,1], index: 7, kind: input, shape index: {}]   ;;  %s3108_s8 = inlined_call_operand.<no memory space> [shape: f32[1,1], index: 8, kind: input, shape index: {}]   ;;  %s3109_s9 = inlined_call_operand.hbm [shape: f32[1,8], index: 9, kind: output, shape index: {}]  }
   0x1   :  { %v14_v0 = vstv %s3108_s8 }
   0x2   :  { %15 = vst [vmem:[#allocation2] sm:$0x1] %v14_v0 }
   0x3   :  { %v102_v1 = vld [vmem:[%s3101_s1] sm:$0xf]  ;;  %vm232_vm0 = vcmask 1043456   ;;  %v2331_v4 = vmov 0   ;;  %vm183_vm1 = vcmask 64512   ;;  %v2227_v7 = vld [vmem:[%s3103_s3 + $0x8] sm:$0xff]  }
   0x4   :  { %v709_v2 = vld [vmem:[%s3104_s4 + $0x80] sm:$0xff]  ;;  %2225 = vset.pattern.permute.xlu1 %v2331_v4  ;;  %2224 = vset.pattern.permute.xlu0 %v2331_v4  ;;  %v234_v5 = vsel %vm232_vm0, %v102_v1, 0  ;;  %v710_v9 = vld [vmem:[%s3104_s4 + $0x88] sm:$0xff]  ;;  %v2229_v11 = vld [vmem:[%s3103_s3 + $0x10] sm:$0xff]   ;;  %vm483_vm2 = vcmask 130048  }
   0x5   :  { %v693_v3 = vld [vmem:[%s3104_s4] sm:$0xff]  ;;  %2221 = vmatprep.subr.msk.bf16.mxu0 %vm232_vm0, %v102_v1  ;;  %807 = vperm.xlu0 %2224, %v709_v2   ;;  %v694_v10 = vld [vmem:[%s3104_s4 + $0x8] sm:$0xff]  ;;  %v711_v12 = vld [vmem:[%s3104_s4 + $0x90] sm:$0xff] }
   0x6   :  { %v2226_v6 = vld [vmem:[%s3103_s3] sm:$0xff]   ;;  %727 = vperm.xlu1 %2225, %v693_v3   ;;  %2106 = vmatpush3.bf16.msra.mxu0 %v234_v5  ;;  %v712_v13 = vld [vmem:[%s3104_s4 + $0x98] sm:$0xff]  ;;  %v695_v15 = vld [vmem:[%s3104_s4 + $0x10] sm:$0xff] }
   0x7   :  { %v2228_v8 = vld [vmem:[%s3100_s0] sm:$0xff]   ;;  %2107 = vmatprep.mubr.msk.bf16.mxu0 %vm183_vm1, %v2226_v6  ;;  %v2230_v14 = vld [vmem:[%s3103_s3 + $0x18] sm:$0xff]   ;;  %v714_v19 = vld [vmem:[%s3104_s4 + $0xa8] sm:$0xff] }
   0x8   :  { %2139 = vmatprep.subr.bf16.mxu0 %v2228_v8  ;;  %v2231_v16 = vld [vmem:[%s3103_s3 + $0x20] sm:$0xff]   ;;  %v696_v17 = vld [vmem:[%s3104_s4 + $0x18] sm:$0xff]  ;;  %v2232_v20 = vld [vmem:[%s3103_s3 + $0x28] sm:$0xff]  }
   0x9   :  { %2108 = vmatmul.mubr.msk.bf16.vlgmr.msra.gmra.mrb[0].mxu0 %vm183_vm1, %v2227_v7  ;;  %812 = vperm.xlu0 %2224, %v710_v9   ;;  %v713_v18 = vld [vmem:[%s3104_s4 + $0xa0] sm:$0xff]  ;;  %v2233_v22 = vld [vmem:[%s3103_s3 + $0x30] sm:$0xff]   ;;  %v698_v23 = vld [vmem:[%s3104_s4 + $0x28] sm:$0xff] }
   0xa   :  { %732 = vperm.xlu1 %2225, %v694_v10   ;;  %2140 = vmatpush3.bf16.msra.mxu0 %v2228_v8  ;;  %v697_v21 = vld [vmem:[%s3104_s4 + $0x20] sm:$0xff]  ;;  %v715_v24 = vld [vmem:[%s3104_s4 + $0xb0] sm:$0xff]  ;;  %v716_v25 = vld [vmem:[%s3104_s4 + $0xb8] sm:$0xff] }
   0xb   :  { %2111 = vmatprep.mubr.msk.bf16.mxu0 %vm183_vm1, %v2229_v11  ;;  %v2234_v26 = vld [vmem:[%s3103_s3 + $0x38] sm:$0xff]   ;;  %v699_v27 = vld [vmem:[%s3104_s4 + $0x30] sm:$0xff]  ;;  %v2235_v28 = vld [vmem:[%s3103_s3 + $0x40] sm:$0xff]  }
   0xc   :  { %v700_v29 = vld [vmem:[%s3104_s4 + $0x38] sm:$0xff]  ;;  %v717_v30 = vld [vmem:[%s3104_s4 + $0xc0] sm:$0xff]  ;;  %v718_v31 = vld [vmem:[%s3104_s4 + $0xc8] sm:$0xff] }
   0xd   :  { %817 = vperm.xlu0 %2224, %v711_v12   ;;  %v2236_v32 = vld [vmem:[%s3103_s3 + $0x48] sm:$0xff]   ;;  %v701_v33 = vld [vmem:[%s3104_s4 + $0x40] sm:$0xff]  ;;  %v2237_v34 = vld [vmem:[%s3103_s3 + $0x50] sm:$0xff]  }
   0xe   :  { %822 = vperm.xlu1 %2225, %v712_v13   ;;  %v702_v35 = vld [vmem:[%s3104_s4 + $0x48] sm:$0xff]  ;;  %v719_v36 = vld [vmem:[%s3104_s4 + $0xd0] sm:$0xff]  ;;  %v720_v37 = vld [vmem:[%s3104_s4 + $0xd8] sm:$0xff] }
   0xf   :  { %v2238_v38 = vld [vmem:[%s3103_s3 + $0x58] sm:$0xff]   ;;  %v703_v39 = vld [vmem:[%s3104_s4 + $0x50] sm:$0xff]  ;;  %v2239_v40 = vld [vmem:[%s3103_s3 + $0x60] sm:$0xff]  }
  0x10   :  { %v704_v41 = vld [vmem:[%s3104_s4 + $0x58] sm:$0xff]  ;;  %v721_v42 = vld [vmem:[%s3104_s4 + $0xe0] sm:$0xff]  ;;  %v722_v43 = vld [vmem:[%s3104_s4 + $0xe8] sm:$0xff] }
  0x11   :  { %2112 = vmatmul.mubr.msk.bf16.gmra.mrb[4].mxu0 %vm183_vm1, %v2230_v14  ;;  %737 = vperm.xlu0 %2224, %v695_v15   ;;  %v2240_v44 = vld [vmem:[%s3103_s3 + $0x68] sm:$0xff]   ;;  %v705_v45 = vld [vmem:[%s3104_s4 + $0x60] sm:$0xff]  ;;  %v2241_v46 = vld [vmem:[%s3103_s3 + $0x70] sm:$0xff]  }
  0x12   :  { %742 = vperm.xlu1 %2225, %v696_v17   ;;  %2115 = vmatprep.mubr.msk.bf16.mxu0 %vm183_vm1, %v2231_v16  ;;  %v706_v47 = vld [vmem:[%s3104_s4 + $0x68] sm:$0xff]  ;;  %v723_v48 = vld [vmem:[%s3104_s4 + $0xf0] sm:$0xff]  ;;  %v724_v49 = vld [vmem:[%s3104_s4 + $0xf8] sm:$0xff] }
  0x13   :  { %v2242_v50 = vld [vmem:[%s3103_s3 + $0x78] sm:$0xff]   ;;  %v707_v51 = vld [vmem:[%s3104_s4 + $0x70] sm:$0xff]  ;;  %v2243_v52 = vld [vmem:[%s3102_s2] sm:$0xff]  }
  0x14   :  { %v708_v53 = vld [vmem:[%s3104_s4 + $0x78] sm:$0xff]  ;;  %v997_v54 = vld [vmem:[%s3106_s6] sm:$0xff]  ;;  %v998_v55 = vld [vmem:[%s3106_s6 + $0x8] sm:$0xff] }
  0x15   :  { %827 = vperm.xlu0 %2224, %v713_v18   ;;  %v2244_v56 = vld [vmem:[%s3102_s2 + $0x8] sm:$0xff]   ;;  %v999_v57 = vld [vmem:[%s3106_s6 + $0x10] sm:$0xff]  ;;  %v1000_v58 = vld [vmem:[%s3106_s6 + $0x18] sm:$0xff] }
  0x16   :  { %832 = vperm.xlu1 %2225, %v714_v19   ;;  %v2245_v59 = vld [vmem:[%s3102_s2 + $0x10] sm:$0xff]   ;;  %v1001_v60 = vld [vmem:[%s3106_s6 + $0x20] sm:$0xff]  ;;  %v1002_v61 = vld [vmem:[%s3106_s6 + $0x28] sm:$0xff] }
  0x17   :  { %v2246_v62 = vld [vmem:[%s3102_s2 + $0x18] sm:$0xff]   ;;  %v1003_v63 = vld [vmem:[%s3106_s6 + $0x30] sm:$0xff]  ;;  %v2247_v0 = vld [vmem:[%s3102_s2 + $0x20] sm:$0xff]  }
  0x18   :  { %v1004_v1 = vld [vmem:[%s3106_s6 + $0x38] sm:$0xff] }
  0x19   :  { %2116 = vmatmul.mubr.msk.bf16.gmra.mrb[8].mxu0 %vm183_vm1, %v2232_v20  ;;  %747 = vperm.xlu0 %2224, %v697_v21  }
  0x1a   :  { %752 = vperm.xlu1 %2225, %v698_v23   ;;  %2119 = vmatprep.mubr.msk.bf16.mxu0 %vm183_vm1, %v2233_v22 }
  0x1d   :  { %837 = vperm.xlu0 %2224, %v715_v24  }
  0x1e   :  { %842 = vperm.xlu1 %2225, %v716_v25  }
  0x21   :  { %2120 = vmatmul.mubr.msk.bf16.gmra.mrb[12].mxu0 %vm183_vm1, %v2234_v26  ;;  %757 = vperm.xlu0 %2224, %v699_v27  }
  0x22   :  { %762 = vperm.xlu1 %2225, %v700_v29   ;;  %2123 = vmatprep.mubr.msk.bf16.mxu0 %vm183_vm1, %v2235_v28 }
  0x25   :  { %847 = vperm.xlu0 %2224, %v717_v30  }
  0x26   :  { %852 = vperm.xlu1 %2225, %v718_v31  }
  0x29   :  { %2124 = vmatmul.mubr.msk.bf16.gmra.mrb[16].mxu0 %vm183_vm1, %v2236_v32  ;;  %767 = vperm.xlu0 %2224, %v701_v33  }
  0x2a   :  { %772 = vperm.xlu1 %2225, %v702_v35   ;;  %2127 = vmatprep.mubr.msk.bf16.mxu0 %vm183_vm1, %v2237_v34 }
  0x2d   :  { %857 = vperm.xlu0 %2224, %v719_v36  }
  0x2e   :  { %862 = vperm.xlu1 %2225, %v720_v37  }
  0x31   :  { %2128 = vmatmul.mubr.msk.bf16.gmra.mrb[20].mxu0 %vm183_vm1, %v2238_v38  ;;  %777 = vperm.xlu0 %2224, %v703_v39  }
  0x32   :  { %782 = vperm.xlu1 %2225, %v704_v41   ;;  %2131 = vmatprep.mubr.msk.bf16.mxu0 %vm183_vm1, %v2239_v40 }
  0x35   :  { %867 = vperm.xlu0 %2224, %v721_v42  }
  0x36   :  { %872 = vperm.xlu1 %2225, %v722_v43  }
  0x39   :  { %2132 = vmatmul.mubr.msk.bf16.gmra.mrb[24].mxu0 %vm183_vm1, %v2240_v44  ;;  %787 = vperm.xlu0 %2224, %v705_v45  }
  0x3a   :  { %792 = vperm.xlu1 %2225, %v706_v47   ;;  %2135 = vmatprep.mubr.msk.bf16.mxu0 %vm183_vm1, %v2241_v46 }
  0x3d   :  { %877 = vperm.xlu0 %2224, %v723_v48  }
  0x3e   :  { %882 = vperm.xlu1 %2225, %v724_v49  }
  0x41   :  { %2136 = vmatmul.mubr.msk.bf16.gmra.mrb[28].mxu0 %vm183_vm1, %v2242_v50  ;;  %797 = vperm.xlu0 %2224, %v707_v51  }
  0x42   :  { %802 = vperm.xlu1 %2225, %v708_v53   ;;  %2141 = vmatprep.mubr.msk.bf16.mxu0 %vm483_vm2, %v2243_v52 }
  0x45   :  { %1031 = vperm.xlu0 %2224, %v997_v54  }
  0x46   :  { %1036 = vperm.xlu1 %2225, %v998_v55  }
  0x49   :  { %2142 = vmatmul.mubr.msk.bf16.vlgmr.msra.gmra.mrb[0].mxu0 %vm483_vm2, %v2244_v56  ;;  %1041 = vperm.xlu0 %2224, %v999_v57  }
  0x4a   :  { %1046 = vperm.xlu1 %2225, %v1000_v58   ;;  %2145 = vmatprep.mubr.msk.bf16.mxu0 %vm483_vm2, %v2245_v59 }
  0x4d   :  { %1051 = vperm.xlu0 %2224, %v1001_v60  }
  0x4e   :  { %1056 = vperm.xlu1 %2225, %v1002_v61  }
  0x4f   :  { %16 = vsyncpa [#allocation4], 0  ;;  %v1005_v2 = vld [vmem:[%s3106_s6 + $0x40] sm:$0xff]  ;;  %v1006_v3 = vld [vmem:[%s3106_s6 + $0x48] sm:$0xff]  ;;  %vm1846_vm3 = vcmask 57344  }
  0x50   :  { %v2248_v4 = vld [vmem:[%s3102_s2 + $0x28] sm:$0xff]   ;;  %v1007_v5 = vld [vmem:[%s3106_s6 + $0x50] sm:$0xff]  ;;  %v1008_v7 = vld [vmem:[%s3106_s6 + $0x58] sm:$0xff] }
  0x51   :  { %2146 = vmatmul.mubr.msk.bf16.gmra.mrb[4].mxu0 %vm483_vm2, %v2246_v62  ;;  %1061 = vperm.xlu0 %2224, %v1003_v63   ;;  %v2249_v6 = vld [vmem:[%s3102_s2 + $0x30] sm:$0xff]   ;;  %v1009_v8 = vld [vmem:[%s3106_s6 + $0x60] sm:$0xff]  ;;  %v1010_v9 = vld [vmem:[%s3106_s6 + $0x68] sm:$0xff] }
  0x52   :  { %1066 = vperm.xlu1 %2225, %v1004_v1   ;;  %2149 = vmatprep.mubr.msk.bf16.mxu0 %vm483_vm2, %v2247_v0  ;;  %v2250_v10 = vld [vmem:[%s3102_s2 + $0x38] sm:$0xff]   ;;  %v1011_v11 = vld [vmem:[%s3106_s6 + $0x70] sm:$0xff]  ;;  %v2251_v12 = vld [vmem:[%s3102_s2 + $0x40] sm:$0xff]  }
  0x53   :  { %v1012_v13 = vld [vmem:[%s3106_s6 + $0x78] sm:$0xff]  ;;  %v1013_v14 = vld [vmem:[%s3106_s6 + $0x80] sm:$0xff]  ;;  %v1014_v15 = vld [vmem:[%s3106_s6 + $0x88] sm:$0xff] }
  0x54   :  { %v2252_v16 = vld [vmem:[%s3102_s2 + $0x48] sm:$0xff]   ;;  %v1015_v17 = vld [vmem:[%s3106_s6 + $0x90] sm:$0xff]  ;;  %v1016_v19 = vld [vmem:[%s3106_s6 + $0x98] sm:$0xff] }
  0x55   :  { %1071 = vperm.xlu0 %2224, %v1005_v2   ;;  %v2253_v18 = vld [vmem:[%s3102_s2 + $0x50] sm:$0xff]   ;;  %v1017_v20 = vld [vmem:[%s3106_s6 + $0xa0] sm:$0xff]  ;;  %v1018_v21 = vld [vmem:[%s3106_s6 + $0xa8] sm:$0xff] }
  0x56   :  { %1076 = vperm.xlu1 %2225, %v1006_v3   ;;  %v2254_v22 = vld [vmem:[%s3102_s2 + $0x58] sm:$0xff]   ;;  %v1019_v23 = vld [vmem:[%s3106_s6 + $0xb0] sm:$0xff]  ;;  %v2255_v24 = vld [vmem:[%s3102_s2 + $0x60] sm:$0xff]  }
  0x57   :  { %v1020_v25 = vld [vmem:[%s3106_s6 + $0xb8] sm:$0xff]  ;;  %v1021_v26 = vld [vmem:[%s3106_s6 + $0xc0] sm:$0xff]  ;;  %v1022_v27 = vld [vmem:[%s3106_s6 + $0xc8] sm:$0xff] }
  0x58   :  { %v2256_v28 = vld [vmem:[%s3102_s2 + $0x68] sm:$0xff]   ;;  %v1023_v29 = vld [vmem:[%s3106_s6 + $0xd0] sm:$0xff]  ;;  %v1024_v31 = vld [vmem:[%s3106_s6 + $0xd8] sm:$0xff] }
  0x59   :  { %2150 = vmatmul.mubr.msk.bf16.gmra.mrb[8].mxu0 %vm483_vm2, %v2248_v4  ;;  %1081 = vperm.xlu0 %2224, %v1007_v5   ;;  %v2257_v30 = vld [vmem:[%s3102_s2 + $0x70] sm:$0xff]   ;;  %v1025_v32 = vld [vmem:[%s3106_s6 + $0xe0] sm:$0xff]  ;;  %v2258_v34 = vld [vmem:[%s3102_s2 + $0x78] sm:$0xff]  }
  0x5a   :  { %1086 = vperm.xlu1 %2225, %v1008_v7   ;;  %2153 = vmatprep.mubr.msk.bf16.mxu0 %vm483_vm2, %v2249_v6  ;;  %v1542_v33 = vld [vmem:[%s3107_s7] sm:$0xff]  ;;  %v1543_v35 = vld [vmem:[%s3107_s7 + $0x8] sm:$0xff]  ;;  %v1544_v36 = vld [vmem:[%s3107_s7 + $0x10] sm:$0xff] }
  0x5b   :  { %v1545_v37 = vld [vmem:[%s3107_s7 + $0x18] sm:$0xff]  ;;  %v1546_v38 = vld [vmem:[%s3107_s7 + $0x20] sm:$0xff]  ;;  %v1547_v39 = vld [vmem:[%s3107_s7 + $0x28] sm:$0xff] }
  0x5c   :  { %v1548_v40 = vld [vmem:[%s3107_s7 + $0x30] sm:$0xff]  ;;  %v1549_v41 = vld [vmem:[%s3107_s7 + $0x38] sm:$0xff]  ;;  %v1550_v42 = vld [vmem:[%s3107_s7 + $0x40] sm:$0xff] }
  0x5d   :  { %1091 = vperm.xlu0 %2224, %v1009_v8   ;;  %v1551_v43 = vld [vmem:[%s3107_s7 + $0x48] sm:$0xff]  ;;  %v1552_v44 = vld [vmem:[%s3107_s7 + $0x50] sm:$0xff]  ;;  %v1553_v45 = vld [vmem:[%s3107_s7 + $0x58] sm:$0xff] }
  0x5e   :  { %1096 = vperm.xlu1 %2225, %v1010_v9   ;;  %v1554_v46 = vld [vmem:[%s3107_s7 + $0x60] sm:$0xff]  ;;  %v1555_v47 = vld [vmem:[%s3107_s7 + $0x68] sm:$0xff]  ;;  %v1556_v48 = vld [vmem:[%s3107_s7 + $0x70] sm:$0xff] }
  0x5f   :  { %v1557_v49 = vld [vmem:[%s3107_s7 + $0x78] sm:$0xff]  ;;  %v1558_v50 = vld [vmem:[%s3107_s7 + $0x80] sm:$0xff]  ;;  %v1559_v51 = vld [vmem:[%s3107_s7 + $0x88] sm:$0xff] }
  0x60   :  { %v1560_v52 = vld [vmem:[%s3107_s7 + $0x90] sm:$0xff]  ;;  %v1561_v53 = vld [vmem:[%s3107_s7 + $0x98] sm:$0xff]  ;;  %v1562_v54 = vld [vmem:[%s3107_s7 + $0xa0] sm:$0xff] }
  0x61   :  { %2154 = vmatmul.mubr.msk.bf16.gmra.mrb[12].mxu0 %vm483_vm2, %v2250_v10  ;;  %1101 = vperm.xlu0 %2224, %v1011_v11   ;;  %v1563_v55 = vld [vmem:[%s3107_s7 + $0xa8] sm:$0xff]  ;;  %v1564_v56 = vld [vmem:[%s3107_s7 + $0xb0] sm:$0xff]  ;;  %v1565_v57 = vld [vmem:[%s3107_s7 + $0xb8] sm:$0xff] }
  0x62   :  { %1106 = vperm.xlu1 %2225, %v1012_v13   ;;  %2157 = vmatprep.mubr.msk.bf16.mxu0 %vm483_vm2, %v2251_v12  ;;  %v1566_v58 = vld [vmem:[%s3107_s7 + $0xc0] sm:$0xff]  ;;  %v1567_v59 = vld [vmem:[%s3107_s7 + $0xc8] sm:$0xff]  ;;  %v1568_v60 = vld [vmem:[%s3107_s7 + $0xd0] sm:$0xff] }
  0x63   :  { %v1026_v61 = vld [vmem:[%s3106_s6 + $0xe8] sm:$0xff]  ;;  %v1569_v62 = vld [vmem:[%s3107_s7 + $0xd8] sm:$0xff]  ;;  %v1027_v63 = vld [vmem:[%s3106_s6 + $0xf0] sm:$0xff] }
  0x64   :  { %v1570_v0 = vld [vmem:[%s3107_s7 + $0xe0] sm:$0xff]  ;;  %v1028_v1 = vld [vmem:[%s3106_s6 + $0xf8] sm:$0xff]  ;;  %v1571_v2 = vld [vmem:[%s3107_s7 + $0xe8] sm:$0xff] }
  0x65   :  { %1111 = vperm.xlu0 %2224, %v1013_v14   ;;  %v1572_v3 = vld [vmem:[%s3107_s7 + $0xf0] sm:$0xff]  ;;  %v1573_v4 = vld [vmem:[%s3107_s7 + $0xf8] sm:$0xff]  ;;  %v1835_v5 = vld [vmem:[#allocation2] sm:$0x1] }
  0x66   :  { %1116 = vperm.xlu1 %2225, %v1014_v15   ;;  %v2261_v10 = vld [vmem:[%s3105_s5 + $0x4] ss:$8 sps:$4 sm:$0xff]   ;;  %v2264_v11 = vld [vmem:[%s3105_s5 + $0x14] ss:$8 sps:$4 sm:$0xff]  }
  0x67   :  { %1389 = vmatprep.mubr.bf16.mxu1 %v2264_v11 }
  0x69   :  { %2158 = vmatmul.mubr.msk.bf16.gmra.mrb[16].mxu0 %vm483_vm2, %v2252_v16  ;;  %1121 = vperm.xlu0 %2224, %v1015_v17  }
  0x6a   :  { %1126 = vperm.xlu1 %2225, %v1016_v19   ;;  %2161 = vmatprep.mubr.msk.bf16.mxu0 %vm483_vm2, %v2253_v18 }
  0x6d   :  { %1131 = vperm.xlu0 %2224, %v1017_v20  }
  0x6e   :  { %1136 = vperm.xlu1 %2225, %v1018_v21  }
  0x71   :  { %2162 = vmatmul.mubr.msk.bf16.gmra.mrb[20].mxu0 %vm483_vm2, %v2254_v22  ;;  %1141 = vperm.xlu0 %2224, %v1019_v23  }
  0x72   :  { %1146 = vperm.xlu1 %2225, %v1020_v25   ;;  %2165 = vmatprep.mubr.msk.bf16.mxu0 %vm483_vm2, %v2255_v24 }
  0x75   :  { %1151 = vperm.xlu0 %2224, %v1021_v26  }
  0x76   :  { %1156 = vperm.xlu1 %2225, %v1022_v27  }
  0x79   :  { %2166 = vmatmul.mubr.msk.bf16.gmra.mrb[24].mxu0 %vm483_vm2, %v2256_v28  ;;  %1161 = vperm.xlu0 %2224, %v1023_v29  }
  0x7a   :  { %1166 = vperm.xlu1 %2225, %v1024_v31   ;;  %2169 = vmatprep.mubr.msk.bf16.mxu0 %vm483_vm2, %v2257_v30 }
  0x7d   :  { %1171 = vperm.xlu0 %2224, %v1025_v32  }
  0x7e   :  { %1576 = vperm.xlu1 %2225, %v1542_v33  }
  0x81   :  { %2170 = vmatmul.mubr.msk.bf16.gmra.mrb[28].mxu0 %vm483_vm2, %v2258_v34  ;;  %1581 = vperm.xlu0 %2224, %v1543_v35  }
  0x82   :  { %1586 = vperm.xlu1 %2225, %v1544_v36   ;;  %1381 = vmatprep.mubr.bf16.mxu0 %v2261_v10 }
  0x84   :  { %v2808_v6 = vpop.permute.xlu0 %807 }
  0x85   :  { %1591 = vperm.xlu0 %2224, %v1545_v37   ;;  %v728_v7 = vpop.permute.xlu1 %727 }
  0x86   :  { %1596 = vperm.xlu1 %2225, %v1546_v38  }
  0x88   :  { %v2810_v8 = vpop.permute.xlu0 %812 }
  0x89   :  { %1601 = vperm.xlu0 %2224, %v1547_v39   ;;  %v733_v9 = vpop.permute.xlu1 %732 }
  0x8a   :  { %1606 = vperm.xlu1 %2225, %v1548_v40  }
  0x8c   :  { %v2818_v12 = vpop.permute.xlu0 %817 }
  0x8d   :  { %1611 = vperm.xlu0 %2224, %v1549_v41   ;;  %v2820_v13 = vpop.permute.xlu1 %822 }
  0x8e   :  { %1616 = vperm.xlu1 %2225, %v1550_v42  }
  0x90   :  { %v738_v14 = vpop.permute.xlu0 %737 }
  0x91   :  { %1621 = vperm.xlu0 %2224, %v1551_v43   ;;  %v743_v15 = vpop.permute.xlu1 %742 }
  0x92   :  { %1626 = vperm.xlu1 %2225, %v1552_v44  }
  0x94   :  { %v2822_v16 = vpop.permute.xlu0 %827 }
  0x95   :  { %1631 = vperm.xlu0 %2224, %v1553_v45   ;;  %v2824_v17 = vpop.permute.xlu1 %832 }
  0x96   :  { %1636 = vperm.xlu1 %2225, %v1554_v46  }
  0x98   :  { %v748_v18 = vpop.permute.xlu0 %747 }
  0x99   :  { %1641 = vperm.xlu0 %2224, %v1555_v47   ;;  %v753_v19 = vpop.permute.xlu1 %752 }
  0x9a   :  { %1646 = vperm.xlu1 %2225, %v1556_v48  }
  0x9c   :  { %v2826_v20 = vpop.permute.xlu0 %837 }
  0x9d   :  { %1651 = vperm.xlu0 %2224, %v1557_v49   ;;  %v2828_v21 = vpop.permute.xlu1 %842 }
  0x9e   :  { %1656 = vperm.xlu1 %2225, %v1558_v50  }
  0xa0   :  { %v758_v22 = vpop.permute.xlu0 %757 }
  0xa1   :  { %1661 = vperm.xlu0 %2224, %v1559_v51   ;;  %v763_v23 = vpop.permute.xlu1 %762 }
  0xa2   :  { %1666 = vperm.xlu1 %2225, %v1560_v52  }
  0xa4   :  { %v2830_v24 = vpop.permute.xlu0 %847 }
  0xa5   :  { %1671 = vperm.xlu0 %2224, %v1561_v53   ;;  %v2832_v25 = vpop.permute.xlu1 %852 }
  0xa6   :  { %1676 = vperm.xlu1 %2225, %v1562_v54  }
  0xa8   :  { %v768_v26 = vpop.permute.xlu0 %767 }
  0xa9   :  { %1681 = vperm.xlu0 %2224, %v1563_v55   ;;  %v773_v27 = vpop.permute.xlu1 %772 }
  0xaa   :  { %1686 = vperm.xlu1 %2225, %v1564_v56  }
  0xac   :  { %v2834_v28 = vpop.permute.xlu0 %857 }
  0xad   :  { %1691 = vperm.xlu0 %2224, %v1565_v57   ;;  %v2836_v29 = vpop.permute.xlu1 %862 }
  0xae   :  { %1696 = vperm.xlu1 %2225, %v1566_v58  }
  0xb0   :  { %v778_v30 = vpop.permute.xlu0 %777 }
  0xb1   :  { %1701 = vperm.xlu0 %2224, %v1567_v59   ;;  %v783_v34 = vpop.permute.xlu1 %782 }
  0xb2   :  { %1706 = vperm.xlu1 %2225, %v1568_v60  }
  0xb4   :  { %v2838_v42 = vpop.permute.xlu0 %867 }
  0xb5   :  { %1176 = vperm.xlu0 %2224, %v1026_v61   ;;  %v2842_v46 = vpop.permute.xlu1 %872 }
  0xb6   :  { %1711 = vperm.xlu1 %2225, %v1569_v62  }
  0xb8   :  { %v788_v55 = vpop.permute.xlu0 %787 }
  0xb9   :  { %1181 = vperm.xlu0 %2224, %v1027_v63   ;;  %v793_v59 = vpop.permute.xlu1 %792 }
  0xba   :  { %1716 = vperm.xlu1 %2225, %v1570_v0  }
  0xbd   :  { %1186 = vperm.xlu0 %2224, %v1028_v1   ;;  %v2852_v10 = vpop.permute.xlu1 %882 }
  0xbe   :  { %1721 = vperm.xlu1 %2225, %v1571_v2  }
  0xc1   :  { %1726 = vperm.xlu0 %2224, %v1572_v3   ;;  %v2850_v3 = vpop.permute.xlu0 %877 }
  0xc2   :  { %1731 = vperm.xlu1 %2225, %v1573_v4  }
  0xc5   :  { %1838 = vperm.xlu0 %2224, %v1835_v5  }
 0x11c   :  { %v2143_v31 = vpop.f32.mrb[0].mxu0 }
 0x11d   :  { %v887_v32 = vadd.f32 %v2143_v31, %v738_v14  ;;  %v566_v33 = vpop.f32.mrb[1].mxu0 }
 0x11e   :  { %v885_v35 = vadd.f32 %v728_v7, %v566_v33  ;;  %v2144_v36 = vpop.f32.mrb[2].mxu0 }
 0x11f   :  { %v888_v37 = vadd.f32 %v2144_v36, %v743_v15  ;;  %v569_v38 = vpop.f32.mrb[3].mxu0  ;;  %v919_v40 = vmax.f32 %v887_v32, 0.0 }
 0x120   :  { %v886_v39 = vadd.f32 %v733_v9, %v569_v38  ;;  %v917_v43 = vmax.f32 %v885_v35, 0.0  ;;  %v803_v35 = vpop.permute.xlu1 %802 }
 0x121   :  { %v920_v41 = vmax.f32 %v888_v37, 0.0 }
 0x122   :  { %v918_v44 = vmax.f32 %v886_v39, 0.0 }
 0x123   :  { %v2840_v45 = vpack.c.bf16 %v920_v41, %v919_v40 }
 0x124   :  { %v2844_v47 = vpack.c.bf16 %v918_v44, %v917_v43  ;;  %v2147_v48 = vpop.f32.mrb[4].mxu0 }
 0x125   :  { %v891_v49 = vadd.f32 %v2147_v48, %v758_v22  ;;  %v582_v50 = vpop.f32.mrb[5].mxu0 }
 0x126   :  { %v889_v51 = vadd.f32 %v748_v18, %v582_v50  ;;  %v2148_v52 = vpop.f32.mrb[6].mxu0 }
 0x127   :  { %v892_v53 = vadd.f32 %v2148_v52, %v763_v23  ;;  %v585_v54 = vpop.f32.mrb[7].mxu0  ;;  %v923_v57 = vmax.f32 %v891_v49, 0.0  ;;  %v798_v23 = vpop.permute.xlu0 %797 }
 0x128   :  { %v890_v56 = vadd.f32 %v753_v19, %v585_v54  ;;  %v921_v60 = vmax.f32 %v889_v51, 0.0 }
 0x129   :  { %v924_v58 = vmax.f32 %v892_v53, 0.0 }
 0x12a   :  { %v922_v61 = vmax.f32 %v890_v56, 0.0 }
 0x12b   :  { %v2846_v62 = vpack.c.bf16 %v924_v58, %v923_v57 }
 0x12c   :  { %v2848_v63 = vpack.c.bf16 %v922_v61, %v921_v60  ;;  %v2151_v0 = vpop.f32.mrb[8].mxu0 }
 0x12d   :  { %v895_v1 = vadd.f32 %v2151_v0, %v778_v30  ;;  %v598_v2 = vpop.f32.mrb[9].mxu0 }
 0x12e   :  { %v893_v4 = vadd.f32 %v768_v26, %v598_v2  ;;  %v2152_v5 = vpop.f32.mrb[10].mxu0 }
 0x12f   :  { %v896_v7 = vadd.f32 %v2152_v5, %v783_v34  ;;  %v601_v9 = vpop.f32.mrb[11].mxu0  ;;  %v927_v14 = vmax.f32 %v895_v1, 0.0 }
 0x130   :  { %v894_v11 = vadd.f32 %v773_v27, %v601_v9  ;;  %v925_v18 = vmax.f32 %v893_v4, 0.0 }
 0x131   :  { %v928_v15 = vmax.f32 %v896_v7, 0.0 }
 0x132   :  { %v926_v19 = vmax.f32 %v894_v11, 0.0 }
 0x133   :  { %v2854_v22 = vpack.c.bf16 %v928_v15, %v927_v14 }
 0x134   :  { %v2856_v31 = vpack.c.bf16 %v926_v19, %v925_v18  ;;  %v2155_v30 = vpop.f32.mrb[12].mxu0 }
 0x135   :  { %v899_v32 = vadd.f32 %v2155_v30, %v798_v23  ;;  %v614_v33 = vpop.f32.mrb[13].mxu0 }
 0x136   :  { %v897_v26 = vadd.f32 %v788_v55, %v614_v33  ;;  %v2156_v36 = vpop.f32.mrb[14].mxu0 }
 0x137   :  { %v900_v34 = vadd.f32 %v2156_v36, %v803_v35  ;;  %v617_v37 = vpop.f32.mrb[15].mxu0  ;;  %v931_v39 = vmax.f32 %v899_v32, 0.0 }
 0x138   :  { %v898_v38 = vadd.f32 %v793_v59, %v617_v37  ;;  %v929_v40 = vmax.f32 %v897_v26, 0.0 }
 0x139   :  { %v932_v27 = vmax.f32 %v900_v34, 0.0 }
 0x13a   :  { %v930_v41 = vmax.f32 %v898_v38, 0.0 }
 0x13b   :  { %v2858_v43 = vpack.c.bf16 %v932_v27, %v931_v39 }
 0x13c   :  { %v2860_v44 = vpack.c.bf16 %v930_v41, %v929_v40  ;;  %v2159_v48 = vpop.f32.mrb[16].mxu0  ;;  %v2268_v40 = vld [vmem:[%s3105_s5 + $0x34] ss:$8 sps:$4 sm:$0xff]   ;;  %v2270_v41 = vld [vmem:[%s3105_s5 + $0x30] ss:$8 sps:$4 sm:$0xff]  }
 0x13d   :  { %v903_v49 = vadd.f32 %v2159_v48, %v2818_v12  ;;  %v630_v50 = vpop.f32.mrb[17].mxu0  ;;  %v2274_v48 = vld [vmem:[%s3105_s5 + $0x54] ss:$8 sps:$4 sm:$0xff]  }
 0x13e   :  { %v901_v51 = vadd.f32 %v2808_v6, %v630_v50  ;;  %v2160_v52 = vpop.f32.mrb[18].mxu0  ;;  %v2277_v50 = vld [vmem:[%s3105_s5 + $0x64] ss:$8 sps:$4 sm:$0xff]  }
 0x13f   :  { %v904_v53 = vadd.f32 %v2160_v52, %v2820_v13  ;;  %v633_v54 = vpop.f32.mrb[19].mxu0  ;;  %v935_v56 = vmax.f32 %v903_v49, 0.0  ;;  %v2276_v49 = vld [vmem:[%s3105_s5 + $0x50] ss:$8 sps:$4 sm:$0xff]   ;;  %v2280_v52 = vld [vmem:[%s3105_s5 + $0x74] ss:$8 sps:$4 sm:$0xff]  }
 0x140   :  { %v902_v55 = vadd.f32 %v2810_v8, %v633_v54  ;;  %v933_v58 = vmax.f32 %v901_v51, 0.0  ;;  %v2279_v51 = vld [vmem:[%s3105_s5 + $0x60] ss:$8 sps:$4 sm:$0xff]   ;;  %v2283_v54 = vld [vmem:[%s3105_s5 + $0x84] ss:$8 sps:$4 sm:$0xff]  }
 0x141   :  { %v936_v57 = vmax.f32 %v904_v53, 0.0  ;;  %v2282_v53 = vld [vmem:[%s3105_s5 + $0x70] ss:$8 sps:$4 sm:$0xff]  }
 0x142   :  { %v934_v59 = vmax.f32 %v902_v55, 0.0  ;;  %v2285_v55 = vld [vmem:[%s3105_s5 + $0x80] ss:$8 sps:$4 sm:$0xff]  }
 0x143   :  { %v990_v60 = vpack.c.bf16 %v936_v57, %v935_v56  ;;  %v2286_v56 = vld [vmem:[%s3105_s5 + $0x94] ss:$8 sps:$4 sm:$0xff]   ;;  %v2288_v57 = vld [vmem:[%s3105_s5 + $0x90] ss:$8 sps:$4 sm:$0xff]  }
 0x144   :  { %v989_v61 = vpack.c.bf16 %v934_v59, %v933_v58  ;;  %v2163_v0 = vpop.f32.mrb[20].mxu0  ;;  %v2289_v58 = vld [vmem:[%s3105_s5 + $0xa4] ss:$8 sps:$4 sm:$0xff]   ;;  %v2291_v59 = vld [vmem:[%s3105_s5 + $0xa0] ss:$8 sps:$4 sm:$0xff]  }
 0x145   :  { %v907_v1 = vadd.f32 %v2163_v0, %v2826_v20  ;;  %v646_v2 = vpop.f32.mrb[21].mxu0  ;;  %v2295_v0 = vld [vmem:[%s3105_s5 + $0xc4] ss:$8 sps:$4 sm:$0xff]  }
 0x146   :  { %v905_v12 = vadd.f32 %v2822_v16, %v646_v2  ;;  %v2164_v4 = vpop.f32.mrb[22].mxu0  ;;  %1993 = vmatprep.subr.bf16.mxu0 %v989_v61  ;;  %2173 = vmatprep.subr.bf16.mxu1 %v989_v61  ;;  %v2294_v61 = vld [vmem:[%s3105_s5 + $0xb0] ss:$8 sps:$4 sm:$0xff]   ;;  %v2298_v2 = vld [vmem:[%s3105_s5 + $0xd4] ss:$8 sps:$4 sm:$0xff]  }
 0x147   :  { %v908_v6 = vadd.f32 %v2164_v4, %v2828_v21  ;;  %v649_v13 = vpop.f32.mrb[23].mxu0  ;;  %1994 = vmatpush3.bf16.msra.mxu0 %v2844_v47  ;;  %2181 = vmatpush3.bf16.msra.mxu1 %v2844_v47  ;;  %v939_v5 = vmax.f32 %v907_v1, 0.0  ;;  %v2297_v1 = vld [vmem:[%s3105_s5 + $0xc0] ss:$8 sps:$4 sm:$0xff]   ;;  %v2301_v4 = vld [vmem:[%s3105_s5 + $0xe4] ss:$8 sps:$4 sm:$0xff]  }
 0x148   :  { %v906_v8 = vadd.f32 %v2824_v17, %v649_v13  ;;  %1995 = vmatprep.subr.bf16.mxu0 %v990_v60  ;;  %2174 = vmatprep.subr.bf16.mxu1 %v990_v60  ;;  %v937_v20 = vmax.f32 %v905_v12, 0.0  ;;  %v2292_v60 = vld [vmem:[%s3105_s5 + $0xb4] ss:$8 sps:$4 sm:$0xff]   ;;  %v2300_v12 = vld [vmem:[%s3105_s5 + $0xd0] ss:$8 sps:$4 sm:$0xff]  }
 0x149   :  { %v940_v7 = vmax.f32 %v908_v6, 0.0  ;;  %v2303_v6 = vld [vmem:[%s3105_s5 + $0xe0] ss:$8 sps:$4 sm:$0xff]   ;;  %v2304_v13 = vld [vmem:[%s3105_s5 + $0xf4] ss:$8 sps:$4 sm:$0xff]  }
 0x14a   :  { %v938_v9 = vmax.f32 %v906_v8, 0.0  ;;  %v2306_v8 = vld [vmem:[%s3105_s5 + $0xf0] ss:$8 sps:$4 sm:$0xff]  }
 0x14b   :  { %v992_v11 = vpack.c.bf16 %v940_v7, %v939_v5  ;;  %1996 = vmatpush3.bf16.msra.mxu0 %v2840_v45  ;;  %2182 = vmatpush3.bf16.msra.mxu1 %v2840_v45  ;;  %v1032_v5 = vpop.permute.xlu0 %1031  ;;  %v1037_v7 = vpop.permute.xlu1 %1036 }
 0x14c   :  { %v991_v16 = vpack.c.bf16 %v938_v9, %v937_v20  ;;  %v2167_v21 = vpop.f32.mrb[24].mxu0 }
 0x14d   :  { %v911_v14 = vadd.f32 %v2167_v21, %v2834_v28  ;;  %v662_v15 = vpop.f32.mrb[25].mxu0 }
 0x14e   :  { %v909_v47 = vadd.f32 %v2830_v24, %v662_v15  ;;  %v2168_v18 = vpop.f32.mrb[26].mxu0  ;;  %1997 = vmatprep.subr.bf16.mxu0 %v991_v16  ;;  %2175 = vmatprep.subr.bf16.mxu1 %v991_v16 }
 0x14f   :  { %v912_v17 = vadd.f32 %v2168_v18, %v2836_v29  ;;  %v665_v19 = vpop.f32.mrb[27].mxu0  ;;  %1998 = vmatpush3.bf16.msra.mxu0 %v2848_v63  ;;  %2183 = vmatpush3.bf16.msra.mxu1 %v2848_v63  ;;  %v943_v45 = vmax.f32 %v911_v14, 0.0  ;;  %v1042_v20 = vpop.permute.xlu0 %1041 }
 0x150   :  { %v910_v23 = vadd.f32 %v2832_v25, %v665_v19  ;;  %1999 = vmatprep.subr.bf16.mxu0 %v992_v11  ;;  %2176 = vmatprep.subr.bf16.mxu1 %v992_v11  ;;  %v941_v28 = vmax.f32 %v909_v47, 0.0  ;;  %v1047_v9 = vpop.permute.xlu1 %1046 }
 0x151   :  { %v944_v30 = vmax.f32 %v912_v17, 0.0 }
 0x152   :  { %v942_v32 = vmax.f32 %v910_v23, 0.0 }
 0x153   :  { %v994_v33 = vpack.c.bf16 %v944_v30, %v943_v45  ;;  %2000 = vmatpush3.bf16.msra.mxu0 %v2846_v62  ;;  %2184 = vmatpush3.bf16.msra.mxu1 %v2846_v62  ;;  %v1052_v11 = vpop.permute.xlu0 %1051 }
 0x154   :  { %v993_v24 = vpack.c.bf16 %v942_v32, %v941_v28  ;;  %v2171_v29 = vpop.f32.mrb[28].mxu0  ;;  %v2984_v16 = vpop.permute.xlu1 %1056 }
 0x155   :  { %v915_v35 = vadd.f32 %v2171_v29, %v2850_v3  ;;  %v678_v26 = vpop.f32.mrb[29].mxu0 }
 0x156   :  { %v913_v63 = vadd.f32 %v2838_v42, %v678_v26  ;;  %v2172_v36 = vpop.f32.mrb[30].mxu0  ;;  %2001 = vmatprep.subr.bf16.mxu0 %v993_v24  ;;  %2177 = vmatprep.subr.bf16.mxu1 %v993_v24 }
 0x157   :  { %v916_v25 = vadd.f32 %v2172_v36, %v2852_v10  ;;  %v681_v34 = vpop.f32.mrb[31].mxu0  ;;  %2002 = vmatpush3.bf16.msra.mxu0 %v2856_v31  ;;  %2185 = vmatpush3.bf16.msra.mxu1 %v2856_v31  ;;  %v947_v62 = vmax.f32 %v915_v35, 0.0  ;;  %v2262_v10 = vld [vmem:[%s3105_s5 + $0x10] ss:$8 sps:$4 sm:$0xff]   ;;  %v2267_v31 = vld [vmem:[%s3105_s5 + $0x20] ss:$8 sps:$4 sm:$0xff]   ;;  %v2986_v21 = vpop.permute.xlu0 %1061 }
 0x158   :  { %v914_v37 = vadd.f32 %v2842_v46, %v681_v34  ;;  %2003 = vmatprep.subr.bf16.mxu0 %v994_v33  ;;  %2178 = vmatprep.subr.bf16.mxu1 %v994_v33  ;;  %v945_v3 = vmax.f32 %v913_v63, 0.0  ;;  %v2259_v46 = vld [vmem:[%s3105_s5] ss:$8 sps:$4 sm:$0xff]   ;;  %v2988_v14 = vpop.permute.xlu1 %1066 }
 0x159   :  { %v948_v38 = vmax.f32 %v916_v25, 0.0 }
 0x15a   :  { %v946_v39 = vmax.f32 %v914_v37, 0.0 }
 0x15b   :  { %v996_v27 = vpack.c.bf16 %v948_v38, %v947_v62  ;;  %2004 = vmatpush3.bf16.msra.mxu0 %v2854_v22  ;;  %2186 = vmatpush3.bf16.msra.mxu1 %v2854_v22  ;;  %v2265_v22 = vld [vmem:[%s3105_s5 + $0x24] ss:$8 sps:$4 sm:$0xff]   ;;  %v2990_v15 = vpop.permute.xlu0 %1071 }
 0x15c   :  { %v995_v42 = vpack.c.bf16 %v946_v39, %v945_v3  ;;  %v2992_v47 = vpop.permute.xlu1 %1076 }
 0x15e   :  { %2005 = vmatprep.subr.bf16.mxu0 %v995_v42  ;;  %2179 = vmatprep.subr.bf16.mxu1 %v995_v42 }
 0x15f   :  { %2006 = vmatpush3.bf16.msra.mxu0 %v2860_v44  ;;  %2187 = vmatpush3.bf16.msra.mxu1 %v2860_v44  ;;  %v2273_v44 = vld [vmem:[%s3105_s5 + $0x40] ss:$8 sps:$4 sm:$0xff]   ;;  %v2994_v18 = vpop.permute.xlu0 %1081 }
 0x160   :  { %2007 = vmatprep.subr.bf16.mxu0 %v996_v27  ;;  %2180 = vmatprep.subr.bf16.mxu1 %v996_v27  ;;  %v2996_v17 = vpop.permute.xlu1 %1086 }
 0x163   :  { %2008 = vmatpush3.bf16.msra.mxu0 %v2858_v43  ;;  %2188 = vmatpush3.bf16.msra.mxu1 %v2858_v43  ;;  %v2271_v43 = vld [vmem:[%s3105_s5 + $0x44] ss:$8 sps:$4 sm:$0xff]   ;;  %v2998_v19 = vpop.permute.xlu0 %1091  ;;  %s2332_s5 = smov [#allocation3]  }
 0x164   :  { %v3000_v23 = vpop.permute.xlu1 %1096  ;;  %s1854_s1 = sshll.u32 %s2332_s5, 4  ;;  %s1855_s1 = int_to_ptr.vmem [resolvable:$true] %s1854_s1 }
 0x165   :  { %s2307_s18 = scalar_lea.vmem %s1855_s1, 16  ;;  %s2311_s19 = scalar_lea.vmem %s1855_s1, 32 }
 0x166   :  { %1382 = vmatmul.mubr.bf16.vlgmr.msra.gmra.mrb[32].mxu0 %v2259_v46  ;;  %1390 = vmatmul.mubr.bf16.vlgmr.msra.gmra.mrb[0].mxu1 %v2262_v10  ;;  %p2308_p0 = scmp.ne.s32.totalorder %s1855_s1, %s2307_s18  ;;  %p2312_p1 = scmp.lt.s32.totalorder %s1855_s1, %s1855_s1 }
 0x167   :  { %1397 = vmatprep.mubr.bf16.mxu1 %v2265_v22  ;;  %v3002_v45 = vpop.permute.xlu0 %1101  ;;  %p2313_p2 = scmp.lt.s32.totalorder %s2311_s19, %s2307_s18 }
 0x168   :  { %v3004_v30 = vpop.permute.xlu1 %1106 }
 0x169   :  { %p2314_p3 = por %p2313_p2, %p2312_p1 }
 0x16b   :  { %v3006_v28 = vpop.permute.xlu0 %1111  ;;  %p2315_p4 = pnand %p2314_p3, %p2308_p0 }
 0x16c   :  { %v3008_v32 = vpop.permute.xlu1 %1116 }
 0x16e   :  { %1398 = vmatmul.mubr.bf16.gmra.mrb[4].mxu1 %v2267_v31 }
 0x16f   :  { %1405 = vmatprep.mubr.bf16.mxu1 %v2268_v40  ;;  %v3010_v33 = vpop.permute.xlu0 %1121 }
 0x170   :  { %v3012_v24 = vpop.permute.xlu1 %1126 }
 0x173   :  { %v3014_v29 = vpop.permute.xlu0 %1131 }
 0x174   :  { %v3016_v35 = vpop.permute.xlu1 %1136 }
 0x176   :  { %1406 = vmatmul.mubr.bf16.gmra.mrb[8].mxu1 %v2270_v41 }
 0x177   :  { %1413 = vmatprep.mubr.bf16.mxu1 %v2271_v43  ;;  %v3018_v26 = vpop.permute.xlu0 %1141 }
 0x178   :  { %v3020_v63 = vpop.permute.xlu1 %1146 }
 0x17b   :  { %v3022_v36 = vpop.permute.xlu0 %1151 }
 0x17c   :  { %v3024_v25 = vpop.permute.xlu1 %1156 }
 0x17e   :  { %1414 = vmatmul.mubr.bf16.gmra.mrb[12].mxu1 %v2273_v44 }
 0x17f   :  { %1421 = vmatprep.mubr.bf16.mxu1 %v2274_v48  ;;  %v3026_v34 = vpop.permute.xlu0 %1161 }
 0x180   :  { %v3028_v37 = vpop.permute.xlu1 %1166 }
 0x183   :  { %v3030_v62 = vpop.permute.xlu0 %1171 }
 0x184   :  { %v1577_v38 = vpop.permute.xlu1 %1576 }
 0x186   :  { %1422 = vmatmul.mubr.bf16.gmra.mrb[16].mxu1 %v2276_v49 }
 0x187   :  { %1429 = vmatprep.mubr.bf16.mxu1 %v2277_v50  ;;  %v1582_v50 = vpop.permute.xlu0 %1581 }
 0x18e   :  { %1430 = vmatmul.mubr.bf16.gmra.mrb[20].mxu1 %v2279_v51 }
 0x18f   :  { %1437 = vmatprep.mubr.bf16.mxu1 %v2280_v52 }
 0x196   :  { %1438 = vmatmul.mubr.bf16.gmra.mrb[24].mxu1 %v2282_v53 }
 0x197   :  { %1445 = vmatprep.mubr.bf16.mxu1 %v2283_v54 }
 0x19e   :  { %1446 = vmatmul.mubr.bf16.gmra.mrb[28].mxu1 %v2285_v55 }
 0x19f   :  { %1453 = vmatprep.mubr.bf16.mxu1 %v2286_v56 }
 0x1a6   :  { %1454 = vmatmul.mubr.bf16.gmra.mrb[32].mxu1 %v2288_v57 }
 0x1a7   :  { %1461 = vmatprep.mubr.bf16.mxu1 %v2289_v58 }
 0x1ae   :  { %1462 = vmatmul.mubr.bf16.gmra.mrb[36].mxu1 %v2291_v59  ;;  %v1587_v59 = vpop.permute.xlu1 %1586 }
 0x1af   :  { %1469 = vmatprep.mubr.bf16.mxu1 %v2292_v60 }
 0x1b6   :  { %1470 = vmatmul.mubr.bf16.gmra.mrb[40].mxu1 %v2294_v61 }
 0x1b7   :  { %1477 = vmatprep.mubr.bf16.mxu1 %v2295_v0 }
 0x1be   :  { %1478 = vmatmul.mubr.bf16.gmra.mrb[44].mxu1 %v2297_v1 }
 0x1bf   :  { %1485 = vmatprep.mubr.bf16.mxu1 %v2298_v2  ;;  %v1592_v2 = vpop.permute.xlu0 %1591 }
 0x1c6   :  { %1486 = vmatmul.mubr.bf16.gmra.mrb[48].mxu1 %v2300_v12 }
 0x1c7   :  { %1493 = vmatprep.mubr.bf16.mxu1 %v2301_v4 }
 0x1ce   :  { %1494 = vmatmul.mubr.bf16.gmra.mrb[52].mxu1 %v2303_v6 }
 0x1cf   :  { %1501 = vmatprep.mubr.bf16.mxu1 %v2304_v13 }
 0x1d6   :  { %1502 = vmatmul.mubr.bf16.gmra.mrb[56].mxu1 %v2306_v8 }
 0x239   :  { %v2009_v3 = vpop.f32.mrb[32].mxu0  ;;  %v2015_v39 = vpop.f32.mrb[0].mxu1 }
 0x23a   :  { %v2010_v27 = vpop.f32.mrb[33].mxu0  ;;  %v2016_v42 = vpop.f32.mrb[1].mxu1 }
 0x23b   :  { %v2011_v46 = vadd.f32 %v2010_v27, %v2009_v3  ;;  %v2017_v10 = vadd.f32 %v2016_v42, %v2015_v39  ;;  %v2012_v22 = vpop.f32.mrb[34].mxu0  ;;  %v2018_v31 = vpop.f32.mrb[2].mxu1 }
 0x23c   :  { %v2013_v40 = vpop.f32.mrb[35].mxu0  ;;  %v2019_v41 = vpop.f32.mrb[3].mxu1 }
 0x23d   :  { %v1384_v43 = vadd.f32 %v2011_v46, %v1032_v5  ;;  %v1392_v44 = vadd.f32 %v2017_v10, %v1042_v20  ;;  %v2014_v48 = vadd.f32 %v2013_v40, %v2012_v22  ;;  %v2020_v49 = vadd.f32 %v2019_v41, %v2018_v31  ;;  %v1597_v27 = vpop.permute.xlu1 %1596  ;;  %v1602_v22 = vpop.permute.xlu0 %1601 }
 0x23f   :  { %v1510_v51 = vmax.f32 %v1384_v43, 0.0  ;;  %v1512_v52 = vmax.f32 %v1392_v44, 0.0  ;;  %v1387_v53 = vadd.f32 %v2014_v48, %v1037_v7  ;;  %v1395_v54 = vadd.f32 %v2020_v49, %v1047_v9 }
 0x241   :  { %v1734_v55 = vmul.f32 %v1577_v38, %v1510_v51  ;;  %v1511_v56 = vmax.f32 %v1387_v53, 0.0  ;;  %v1513_v57 = vmax.f32 %v1395_v54, 0.0  ;;  %v2021_v58 = vpop.f32.mrb[4].mxu1  ;;  %v1736_v61 = vmul.f32 %v1587_v59, %v1512_v52 }
 0x242   :  { %v2022_v60 = vpop.f32.mrb[5].mxu1 }
 0x243   :  { %v1735_v0 = vmul.f32 %v1582_v50, %v1511_v56  ;;  %v2024_v1 = vpop.f32.mrb[6].mxu1  ;;  %v2023_v12 = vadd.f32 %v2022_v60, %v2021_v58  ;;  %v1766_v6 = vsel %vm183_vm1, %v1734_v55, 0.0  ;;  %v1737_v8 = vmul.f32 %v1592_v2, %v1513_v57  ;;  %v1607_v56 = vpop.permute.xlu1 %1606 }
 0x244   :  { %v2025_v4 = vpop.f32.mrb[7].mxu1  ;;  %v1769_v9 = vsel %vm183_vm1, %v1736_v61, 0.0  ;;  %v1612_v60 = vpop.permute.xlu0 %1611 }
 0x245   :  { %v1767_v13 = vsel %vm183_vm1, %v1735_v0, 0.0  ;;  %v2026_v5 = vadd.f32 %v2025_v4, %v2024_v1  ;;  %v1400_v20 = vadd.f32 %v2023_v12, %v1052_v11  ;;  %v1771_v42 = vsel %vm183_vm1, %v1737_v8, 0.0 }
 0x246   :  { %v1768_v7 = vadd.f32 %v1767_v13, %v1766_v6 }
 0x247   :  { %v1403_v38 = vadd.f32 %v2026_v5, %v2984_v16  ;;  %v1514_v39 = vmax.f32 %v1400_v20, 0.0  ;;  %v1617_v20 = vpop.permute.xlu1 %1616 }
 0x248   :  { %v1770_v3 = vadd.f32 %v1769_v9, %v1768_v7 }
 0x249   :  { %v1515_v46 = vmax.f32 %v1403_v38, 0.0  ;;  %v2027_v10 = vpop.f32.mrb[8].mxu1  ;;  %v1738_v40 = vmul.f32 %v1597_v27, %v1514_v39  ;;  %v1622_v39 = vpop.permute.xlu0 %1621 }
 0x24a   :  { %v1772_v31 = vadd.f32 %v1771_v42, %v1770_v3  ;;  %v2028_v41 = vpop.f32.mrb[9].mxu1 }
 0x24b   :  { %v1739_v43 = vmul.f32 %v1602_v22, %v1515_v46  ;;  %v2029_v44 = vadd.f32 %v2028_v41, %v2027_v10  ;;  %v2030_v48 = vpop.f32.mrb[10].mxu1  ;;  %v1773_v11 = vsel %vm183_vm1, %v1738_v40, 0.0 }
 0x24c   :  { %v2031_v49 = vpop.f32.mrb[11].mxu1  ;;  %v1774_v50 = vadd.f32 %v1773_v11, %v1772_v31  ;;  %v1627_v11 = vpop.permute.xlu1 %1626 }
 0x24d   :  { %v1775_v16 = vsel %vm183_vm1, %v1739_v43, 0.0  ;;  %v1408_v51 = vadd.f32 %v2029_v44, %v2986_v21  ;;  %v2032_v52 = vadd.f32 %v2031_v49, %v2030_v48 }
 0x24e   :  { %v1776_v53 = vadd.f32 %v1775_v16, %v1774_v50 }
 0x24f   :  { %v1516_v54 = vmax.f32 %v1408_v51, 0.0  ;;  %v1411_v55 = vadd.f32 %v2032_v52, %v2988_v14  ;;  %v1632_v51 = vpop.permute.xlu0 %1631 }
 0x251   :  { %v1740_v57 = vmul.f32 %v1607_v56, %v1516_v54  ;;  %v1517_v58 = vmax.f32 %v1411_v55, 0.0  ;;  %v2033_v59 = vpop.f32.mrb[12].mxu1 }
 0x252   :  { %v2034_v61 = vpop.f32.mrb[13].mxu1 }
 0x253   :  { %v1777_v0 = vsel %vm183_vm1, %v1740_v57, 0.0  ;;  %v1741_v1 = vmul.f32 %v1612_v60, %v1517_v58  ;;  %v2035_v2 = vadd.f32 %v2034_v61, %v2033_v59  ;;  %v2036_v12 = vpop.f32.mrb[14].mxu1 }
 0x254   :  { %v1778_v4 = vadd.f32 %v1777_v0, %v1776_v53  ;;  %v2037_v6 = vpop.f32.mrb[15].mxu1 }
 0x255   :  { %v1779_v21 = vsel %vm183_vm1, %v1741_v1, 0.0  ;;  %v1416_v13 = vadd.f32 %v2035_v2, %v2990_v15  ;;  %v2038_v8 = vadd.f32 %v2037_v6, %v2036_v12  ;;  %v1637_v1 = vpop.permute.xlu1 %1636  ;;  %v1642_v6 = vpop.permute.xlu0 %1641 }
 0x256   :  { %v1780_v5 = vadd.f32 %v1779_v21, %v1778_v4 }
 0x257   :  { %v1518_v14 = vmax.f32 %v1416_v13, 0.0  ;;  %v1419_v7 = vadd.f32 %v2038_v8, %v2992_v47 }
 0x259   :  { %v1742_v9 = vmul.f32 %v1617_v20, %v1518_v14  ;;  %v1519_v38 = vmax.f32 %v1419_v7, 0.0  ;;  %v2039_v3 = vpop.f32.mrb[16].mxu1 }
 0x25a   :  { %v2040_v27 = vpop.f32.mrb[17].mxu1 }
 0x25b   :  { %v1781_v42 = vsel %vm183_vm1, %v1742_v9, 0.0  ;;  %v1743_v46 = vmul.f32 %v1622_v39, %v1519_v38  ;;  %v2041_v10 = vadd.f32 %v2040_v27, %v2039_v3  ;;  %v2042_v22 = vpop.f32.mrb[18].mxu1  ;;  %v1647_v27 = vpop.permute.xlu1 %1646 }
 0x25c   :  { %v1782_v31 = vadd.f32 %v1781_v42, %v1780_v5  ;;  %v2043_v40 = vpop.f32.mrb[19].mxu1 }
 0x25d   :  { %v1783_v15 = vsel %vm183_vm1, %v1743_v46, 0.0  ;;  %v1424_v41 = vadd.f32 %v2041_v10, %v2994_v18  ;;  %v2044_v43 = vadd.f32 %v2043_v40, %v2042_v22  ;;  %v1652_v22 = vpop.permute.xlu0 %1651 }
 0x25e   :  { %v1784_v44 = vadd.f32 %v1783_v15, %v1782_v31 }
 0x25f   :  { %v1520_v47 = vmax.f32 %v1424_v41, 0.0  ;;  %v1427_v48 = vadd.f32 %v2044_v43, %v2996_v17 }
 0x261   :  { %v1744_v49 = vmul.f32 %v1627_v11, %v1520_v47  ;;  %v1521_v50 = vmax.f32 %v1427_v48, 0.0  ;;  %v2045_v16 = vpop.f32.mrb[20].mxu1 }
 0x262   :  { %v2046_v52 = vpop.f32.mrb[21].mxu1 }
 0x263   :  { %v1785_v53 = vsel %vm183_vm1, %v1744_v49, 0.0  ;;  %v1745_v54 = vmul.f32 %v1632_v51, %v1521_v50  ;;  %v2047_v55 = vadd.f32 %v2046_v52, %v2045_v16  ;;  %v2048_v56 = vpop.f32.mrb[22].mxu1  ;;  %v1657_v16 = vpop.permute.xlu1 %1656 }
 0x264   :  { %v1786_v57 = vadd.f32 %v1785_v53, %v1784_v44  ;;  %v2049_v58 = vpop.f32.mrb[23].mxu1 }
 0x265   :  { %v1787_v18 = vsel %vm183_vm1, %v1745_v54, 0.0  ;;  %v1432_v59 = vadd.f32 %v2047_v55, %v2998_v19  ;;  %v2050_v60 = vadd.f32 %v2049_v58, %v2048_v56  ;;  %v1662_v54 = vpop.permute.xlu0 %1661 }
 0x266   :  { %v1788_v61 = vadd.f32 %v1787_v18, %v1786_v57 }
 0x267   :  { %v1522_v17 = vmax.f32 %v1432_v59, 0.0  ;;  %v1435_v0 = vadd.f32 %v2050_v60, %v3000_v23 }
 0x269   :  { %v1746_v2 = vmul.f32 %v1637_v1, %v1522_v17  ;;  %v1523_v12 = vmax.f32 %v1435_v0, 0.0  ;;  %v2051_v4 = vpop.f32.mrb[24].mxu1 }
 0x26a   :  { %v2052_v21 = vpop.f32.mrb[25].mxu1 }
 0x26b   :  { %v1789_v13 = vsel %vm183_vm1, %v1746_v2, 0.0  ;;  %v1747_v8 = vmul.f32 %v1642_v6, %v1523_v12  ;;  %v2053_v5 = vadd.f32 %v2052_v21, %v2051_v4  ;;  %v2054_v14 = vpop.f32.mrb[26].mxu1  ;;  %v1667_v2 = vpop.permute.xlu1 %1666 }
 0x26c   :  { %v1790_v7 = vadd.f32 %v1789_v13, %v1788_v61  ;;  %v2055_v20 = vpop.f32.mrb[27].mxu1  ;;  %v1672_v21 = vpop.permute.xlu0 %1671 }
 0x26d   :  { %v1791_v19 = vsel %vm183_vm1, %v1747_v8, 0.0  ;;  %v1440_v9 = vadd.f32 %v2053_v5, %v3002_v45  ;;  %v2056_v38 = vadd.f32 %v2055_v20, %v2054_v14 }
 0x26e   :  { %v1792_v3 = vadd.f32 %v1791_v19, %v1790_v7 }
 0x26f   :  { %v1524_v23 = vmax.f32 %v1440_v9, 0.0  ;;  %v1443_v39 = vadd.f32 %v2056_v38, %v3004_v30 }
 0x271   :  { %v1748_v42 = vmul.f32 %v1647_v27, %v1524_v23  ;;  %v1525_v46 = vmax.f32 %v1443_v39, 0.0  ;;  %v2057_v10 = vpop.f32.mrb[28].mxu1 }
 0x272   :  { %v2058_v31 = vpop.f32.mrb[29].mxu1 }
 0x273   :  { %v1793_v40 = vsel %vm183_vm1, %v1748_v42, 0.0  ;;  %v1749_v15 = vmul.f32 %v1652_v22, %v1525_v46  ;;  %v2059_v41 = vadd.f32 %v2058_v31, %v2057_v10  ;;  %v2060_v43 = vpop.f32.mrb[30].mxu1  ;;  %v1682_v10 = vpop.permute.xlu0 %1681 }
 0x274   :  { %v1794_v44 = vadd.f32 %v1793_v40, %v1792_v3  ;;  %v2061_v47 = vpop.f32.mrb[31].mxu1  ;;  %v1677_v3 = vpop.permute.xlu1 %1676 }
 0x275   :  { %v1795_v45 = vsel %vm183_vm1, %v1749_v15, 0.0  ;;  %v1448_v48 = vadd.f32 %v2059_v41, %v3006_v28  ;;  %v2062_v11 = vadd.f32 %v2061_v47, %v2060_v43 }
 0x276   :  { %v1796_v49 = vadd.f32 %v1795_v45, %v1794_v44 }
 0x277   :  { %v1526_v30 = vmax.f32 %v1448_v48, 0.0  ;;  %v1451_v50 = vadd.f32 %v2062_v11, %v3008_v32 }
 0x278   :  { %v1687_v43 = vpop.permute.xlu1 %1686 }
 0x279   :  { %v1750_v51 = vmul.f32 %v1657_v16, %v1526_v30  ;;  %v1527_v52 = vmax.f32 %v1451_v50, 0.0  ;;  %v2063_v53 = vpop.f32.mrb[32].mxu1  ;;  %v1692_v30 = vpop.permute.xlu0 %1691 }
 0x27a   :  { %v2064_v55 = vpop.f32.mrb[33].mxu1 }
 0x27b   :  { %v1797_v56 = vsel %vm183_vm1, %v1750_v51, 0.0  ;;  %v1751_v57 = vmul.f32 %v1662_v54, %v1527_v52  ;;  %v2065_v58 = vadd.f32 %v2064_v55, %v2063_v53  ;;  %v2066_v18 = vpop.f32.mrb[34].mxu1 }
 0x27c   :  { %v1798_v59 = vadd.f32 %v1797_v56, %v1796_v49  ;;  %v2067_v60 = vpop.f32.mrb[35].mxu1  ;;  %v1697_v52 = vpop.permute.xlu1 %1696 }
 0x27d   :  { %v1799_v28 = vsel %vm183_vm1, %v1751_v57, 0.0  ;;  %v1456_v61 = vadd.f32 %v2065_v58, %v3010_v33  ;;  %v2068_v17 = vadd.f32 %v2067_v60, %v2066_v18 }
 0x27e   :  { %v1800_v0 = vadd.f32 %v1799_v28, %v1798_v59 }
 0x27f   :  { %v1528_v32 = vmax.f32 %v1456_v61, 0.0  ;;  %v1459_v1 = vadd.f32 %v2068_v17, %v3012_v24 }
 0x281   :  { %v1752_v12 = vmul.f32 %v1667_v2, %v1528_v32  ;;  %v1529_v4 = vmax.f32 %v1459_v1, 0.0  ;;  %v2069_v6 = vpop.f32.mrb[36].mxu1 }
 0x282   :  { %v2070_v13 = vpop.f32.mrb[37].mxu1 }
 0x283   :  { %v1801_v8 = vsel %vm183_vm1, %v1752_v12, 0.0  ;;  %v1753_v5 = vmul.f32 %v1672_v21, %v1529_v4  ;;  %v2071_v14 = vadd.f32 %v2070_v13, %v2069_v6  ;;  %v2072_v7 = vpop.f32.mrb[38].mxu1 }
 0x284   :  { %v1802_v20 = vadd.f32 %v1801_v8, %v1800_v0  ;;  %v2073_v19 = vpop.f32.mrb[39].mxu1  ;;  %v1707_v0 = vpop.permute.xlu1 %1706 }
 0x285   :  { %v1803_v33 = vsel %vm183_vm1, %v1753_v5, 0.0  ;;  %v1464_v9 = vadd.f32 %v2071_v14, %v3014_v29  ;;  %v2074_v38 = vadd.f32 %v2073_v19, %v2072_v7 }
 0x286   :  { %v1804_v24 = vadd.f32 %v1803_v33, %v1802_v20 }
 0x287   :  { %v1530_v23 = vmax.f32 %v1464_v9, 0.0  ;;  %v1467_v39 = vadd.f32 %v2074_v38, %v3016_v35 }
 0x288   :  { %v1712_v19 = vpop.permute.xlu1 %1711 }
 0x289   :  { %v1754_v27 = vmul.f32 %v1677_v3, %v1530_v23  ;;  %v1531_v42 = vmax.f32 %v1467_v39, 0.0  ;;  %v2075_v46 = vpop.f32.mrb[40].mxu1 }
 0x28a   :  { %v2076_v22 = vpop.f32.mrb[41].mxu1 }
 0x28b   :  { %v1805_v31 = vsel %vm183_vm1, %v1754_v27, 0.0  ;;  %v1755_v40 = vmul.f32 %v1682_v10, %v1531_v42  ;;  %v2077_v15 = vadd.f32 %v2076_v22, %v2075_v46  ;;  %v2078_v41 = vpop.f32.mrb[42].mxu1 }
 0x28c   :  { %v1806_v44 = vadd.f32 %v1805_v31, %v1804_v24  ;;  %v2079_v47 = vpop.f32.mrb[43].mxu1  ;;  %v1717_v22 = vpop.permute.xlu1 %1716 }
 0x28d   :  { %v1807_v29 = vsel %vm183_vm1, %v1755_v40, 0.0  ;;  %v1472_v45 = vadd.f32 %v2077_v15, %v3018_v26  ;;  %v2080_v48 = vadd.f32 %v2079_v47, %v2078_v41 }
 0x28e   :  { %v1808_v11 = vadd.f32 %v1807_v29, %v1806_v44 }
 0x28f   :  { %v1532_v35 = vmax.f32 %v1472_v45, 0.0  ;;  %v1475_v49 = vadd.f32 %v2080_v48, %v3020_v63  ;;  %v1702_v63 = vpop.permute.xlu0 %1701 }
 0x291   :  { %v1756_v50 = vmul.f32 %v1687_v43, %v1532_v35  ;;  %v1533_v16 = vmax.f32 %v1475_v49, 0.0  ;;  %v2081_v51 = vpop.f32.mrb[44].mxu1 }
 0x292   :  { %v2082_v53 = vpop.f32.mrb[45].mxu1 }
 0x293   :  { %v1809_v54 = vsel %vm183_vm1, %v1756_v50, 0.0  ;;  %v1757_v55 = vmul.f32 %v1692_v30, %v1533_v16  ;;  %v2083_v56 = vadd.f32 %v2082_v53, %v2081_v51  ;;  %v2084_v57 = vpop.f32.mrb[46].mxu1  ;;  %v1177_v14 = vpop.permute.xlu0 %1176 }
 0x294   :  { %v1810_v58 = vadd.f32 %v1809_v54, %v1808_v11  ;;  %v2085_v18 = vpop.f32.mrb[47].mxu1  ;;  %v1722_v11 = vpop.permute.xlu1 %1721 }
 0x295   :  { %v1811_v26 = vsel %vm183_vm1, %v1757_v55, 0.0  ;;  %v1480_v59 = vadd.f32 %v2083_v56, %v3022_v36  ;;  %v2086_v60 = vadd.f32 %v2085_v18, %v2084_v57 }
 0x296   :  { %v1812_v28 = vadd.f32 %v1811_v26, %v1810_v58 }
 0x297   :  { %v1534_v61 = vmax.f32 %v1480_v59, 0.0  ;;  %v1483_v17 = vadd.f32 %v2086_v60, %v3024_v25  ;;  %v1182_v39 = vpop.permute.xlu0 %1181 }
 0x298   :  { %v1732_v59 = vpop.permute.xlu1 %1731 }
 0x299   :  { %v1758_v32 = vmul.f32 %v1697_v52, %v1534_v61  ;;  %v1535_v1 = vmax.f32 %v1483_v17, 0.0  ;;  %v2087_v2 = vpop.f32.mrb[48].mxu1  ;;  %v1841_v17 = vlaneseq }
 0x29a   :  { %v2088_v12 = vpop.f32.mrb[49].mxu1 }
 0x29b   :  { %v1813_v4 = vsel %vm183_vm1, %v1758_v32, 0.0  ;;  %v1759_v6 = vmul.f32 %v1702_v63, %v1535_v1  ;;  %v2089_v21 = vadd.f32 %v2088_v12, %v2087_v2  ;;  %v2090_v13 = vpop.f32.mrb[50].mxu1  ;;  %v1187_v47 = vpop.permute.xlu0 %1186  ;;  %v1842_v1 = vshrl.u32 %v1841_v17, 7 }
 0x29c   :  { %v1814_v8 = vadd.f32 %v1813_v4, %v1812_v28  ;;  %v2091_v5 = vpop.f32.mrb[51].mxu1 }
 0x29d   :  { %v1815_v36 = vsel %vm183_vm1, %v1759_v6, 0.0  ;;  %v1488_v7 = vadd.f32 %v2089_v21, %v3026_v34  ;;  %v2092_v20 = vadd.f32 %v2091_v5, %v2090_v13  ;;  %v1843_v4 = vsub.s32 0, %v1842_v1 }
 0x29e   :  { %v1816_v25 = vadd.f32 %v1815_v36, %v1814_v8 }
 0x29f   :  { %v1536_v33 = vmax.f32 %v1488_v7, 0.0  ;;  %v1491_v9 = vadd.f32 %v2092_v20, %v3028_v37  ;;  %v1727_v58 = vpop.permute.xlu0 %1726 }
 0x2a1   :  { %v1760_v38 = vmul.f32 %v1707_v0, %v1536_v33  ;;  %v1537_v3 = vmax.f32 %v1491_v9, 0.0  ;;  %v2093_v24 = vpop.f32.mrb[52].mxu1 }
 0x2a2   :  { %v2094_v23 = vpop.f32.mrb[53].mxu1 }
 0x2a3   :  { %v1817_v27 = vsel %vm183_vm1, %v1760_v38, 0.0  ;;  %v1761_v42 = vmul.f32 %v1712_v19, %v1537_v3  ;;  %v2095_v46 = vadd.f32 %v2094_v23, %v2093_v24  ;;  %v2096_v10 = vpop.f32.mrb[54].mxu1  ;;  %v1839_v21 = vpop.permute.xlu0 %1838 }
 0x2a4   :  { %v1818_v31 = vadd.f32 %v1817_v27, %v1816_v25  ;;  %v2097_v40 = vpop.f32.mrb[55].mxu1  ;;  %v1844_v8 = vrot.slane %v1839_v21, %v1843_v4 }
 0x2a5   :  { %v1819_v34 = vsel %vm183_vm1, %v1761_v42, 0.0  ;;  %v1496_v15 = vadd.f32 %v2095_v46, %v3030_v62  ;;  %v2098_v41 = vadd.f32 %v2097_v40, %v2096_v10 }
 0x2a6   :  { %v1820_v43 = vadd.f32 %v1819_v34, %v1818_v31 }
 0x2a7   :  { %v1538_v37 = vmax.f32 %v1496_v15, 0.0  ;;  %v1499_v44 = vadd.f32 %v2098_v41, %v1177_v14 }
 0x2a9   :  { %v1762_v29 = vmul.f32 %v1717_v22, %v1538_v37  ;;  %v1539_v45 = vmax.f32 %v1499_v44, 0.0  ;;  %v2099_v48 = vpop.f32.mrb[56].mxu1 }
 0x2aa   :  { %v2100_v35 = vpop.f32.mrb[57].mxu1 }
 0x2ab   :  { %v1821_v49 = vsel %vm183_vm1, %v1762_v29, 0.0  ;;  %v1763_v30 = vmul.f32 %v1722_v11, %v1539_v45  ;;  %v2101_v50 = vadd.f32 %v2100_v35, %v2099_v48  ;;  %v2102_v16 = vpop.f32.mrb[58].mxu1 }
 0x2ac   :  { %v1822_v51 = vadd.f32 %v1821_v49, %v1820_v43  ;;  %v2103_v52 = vpop.f32.mrb[59].mxu1 }
 0x2ad   :  { %v1823_v53 = vsel %vm183_vm1, %v1763_v30, 0.0  ;;  %v1504_v62 = vadd.f32 %v2101_v50, %v1182_v39  ;;  %v2104_v54 = vadd.f32 %v2103_v52, %v2102_v16 }
 0x2ae   :  { %v1824_v55 = vadd.f32 %v1823_v53, %v1822_v51 }
 0x2af   :  { %v1540_v56 = vmax.f32 %v1504_v62, 0.0  ;;  %v1507_v57 = vadd.f32 %v2104_v54, %v1187_v47 }
 0x2b1   :  { %v1764_v18 = vmul.f32 %v1727_v58, %v1540_v56  ;;  %v1541_v26 = vmax.f32 %v1507_v57, 0.0 }
 0x2b3   :  { %v1825_v60 = vsel %vm183_vm1, %v1764_v18, 0.0  ;;  %v1765_v28 = vmul.f32 %v1732_v59, %v1541_v26 }
 0x2b4   :  { %v1826_v63 = vadd.f32 %v1825_v60, %v1824_v55 }
 0x2b5   :  { %v1827_v61 = vsel %vm183_vm1, %v1765_v28, 0.0 }
 0x2b6   :  { %v1828_v0 = vadd.f32 %v1827_v61, %v1826_v63 }
 0x2b8   :  { %v1829_v32 = vrot.slane %v1828_v0, 4 }
 0x2ba   :  { %v1830_v2 = vadd.f32 %v1829_v32, %v1828_v0 }
 0x2bc   :  { %v1831_v12 = vrot.slane %v1830_v2, 2 }
 0x2be   :  { %v1832_v6 = vadd.f32 %v1831_v12, %v1830_v2 }
 0x2c0   :  { %v1833_v13 = vrot.slane %v1832_v6, 1 }
 0x2c2   :  { %v1834_v5 = vadd.f32 %v1833_v13, %v1832_v6 }
 0x2c4   :  { %v1845_v14 = vadd.f32 %v1844_v8, %v1834_v5 }
 0x2c6   :  { %1847 = vst.msk [vmem:[#allocation3] sm:$0x1] %vm1846_vm3, %v1845_v14 }
 0x2c7   :  { %2318 = shalt.err (!%p2315_p4)
}
 0x2c8   :  { %s2319_s21 = scalar_lea.hbm %s3109_s9, 16 }
 0x2c9   :  { %p2320_p5 = scmp.ne.s32.totalorder %s3109_s9, %s2319_s21  ;;  %p2323_p6 = scmp.lt.u32.totalorder %s2319_s21, %s3109_s9 }
 0x2cb   :  { %p2325_p7 = pnand %p2323_p6, %p2320_p5 }
 0x2cd   :  { %2328 = shalt.err (!%p2325_p7)
}
 0x2ce   :  { %1857 = dma.vmem_to_hbm [thread:$0]  %s1855_s1, 16, %s3109_s9, [#allocation4]  }
 0x2cf   :  { %2329 = dma.done.wait [#allocation4], 16  }
 0x2d0   :  { %2330 = vsyncadd [#allocation4], 4294967280 }
 0x2d1   :  { %1861 = vsyncpa [#allocation4], 1 }

</bundles_post_ra>
